<compile_context>
chip_gen: v5e
topology: v5e:2x2
jax: 0.10.0
libtpu: 0.0.40
codegen_flags: <defaults>
</compile_context>

<pallas_src>
import numpy as np
import jax
import jax.numpy as jnp
from jax.experimental import pallas as pl
from jax.experimental.pallas import tpu as pltpu

LANE = 128


# ----------------------------------------------------------------------------
# Kernel
# ----------------------------------------------------------------------------
def make_kan_fused_kernel(k: int, knots, h: float, cout: int, d_model: int):
    """Fused KAN([d_model,1]) layer + broadcast-add.

    Layout (all f32):
      xT   : (D, TN)     batch on the lane axis
      cT   : (D, G+k)    spline coefficients, pre-scaled by mask*scale_sp
      sbT  : (D, 1)      mask*scale_base
      addT : (Cout, 1)   per-output-row additive term (biases + cached logits)
      out  : (Cout, TN)  out[c, n] = sum_j(...) over features + addT[c]

    Knots and per-level 1/(kk*h) are baked as scalar immediates (uniform,
    feature-shared grid).
    """
    n0 = len(knots) - 1                         # number of order-0 bases = G + 2k
    inv = [1.0 / (kk * h) for kk in range(1, k + 1)]

    def kernel(xT_ref, cT_ref, sbT_ref, addT_ref, out_ref):
        # Small per-feature operands, loaded once per grid step.
        c = cT_ref[...]                          # (D, G+k)
        sb = sbT_ref[...]                        # (D, 1)
        add = addT_ref[...]                      # (Cout, 1)
        ones_w = jnp.ones((cout, d_model), jnp.float32)   # MXU feature-sum weights

        tn = xT_ref.shape[-1]
        n_chunks = tn // LANE

        # One 128-lane column chunk per iteration: keeps the unrolled
        # recursion's live set in vregs while the BlockSpec tile stays large.
        @pl.loop(0, n_chunks)
        def _(ci):
            off = pl.multiple_of(ci * LANE, LANE)
            x = xT_ref[:, pl.ds(off, LANE)]      # (D, 128)

            # SiLU base; exp + approx reciprocal run on the EUP slot.
            base = x * pl.reciprocal(1.0 + jnp.exp(-x), approx=True)

            # Order-0 bases from shared monotone compares:
            #   ge_i = [x >= t_i]  (0/1, nonincreasing in i)
            #   B_i  = ge_i - ge_{i+1}  ==  [t_i <= x < t_{i+1}]
            # Half-open intervals: x exactly at the right-most extended knot
            # gets an all-zero spline contribution (matches the reference).
            ge = [(x >= knots[i]).astype(jnp.float32) for i in range(n0 + 1)]
            B = [ge[i] - ge[i + 1] for i in range(n0)]

            # Cox-de Boor recursion on a uniform grid with shared weights:
            #   w_j = (x - t_j) * (1/(kk*h))
            #   B_i <- w_i * B_i + (1 - w_{i+1}) * B_{i+1}
            # Coefficient multiply-accumulate fused into the last level.
            spline = None
            for kk in range(1, k + 1):
                ikk = inv[kk - 1]
                nb = n0 - kk
                w = [(x - knots[j]) * ikk for j in range(nb + 1)]
                last = kk == k
                newB = []
                for i in range(nb):
                    b = w[i] * B[i] + (1.0 - w[i + 1]) * B[i + 1]
                    if last:
                        term = b * c[:, i:i + 1]
                        spline = term if spline is None else spline + term
                    else:
                        newB.append(b)
                if not last:
                    B = newB
            if spline is None:                   # degenerate k == 0
                spline = B[0] * c[:, 0:1]
                for i in range(1, n0):
                    spline = spline + B[i] * c[:, i:i + 1]

            y = sb * base + spline               # (D, 128)
            # Epilogue on the otherwise-idle MXU: ones(Cout,D) @ y gives the
            # feature sum already replicated across all Cout output rows.
            out_ref[:, pl.ds(off, LANE)] = (
                jnp.dot(ones_w, y, preferred_element_type=jnp.float32) + add)

    return kernel


# ----------------------------------------------------------------------------
# Wrapper
# ----------------------------------------------------------------------------
def _round_up(a, b):
    return (a + b - 1) // b * b


def _choose_tiling(n_rows, d_model, cout):
    """Generation-aware batch tile and VMEM limit.

    With in-kernel 128-lane chunking the per-step VMEM is only the
    double-buffered (D, tn) input block and (Cout, tn) output block; the
    recursion intermediates live in registers per chunk.
    """
    try:
        phys = int(pltpu.get_tpu_info().vmem_capacity_bytes)
    except Exception:                            # non-TPU tracing fallback
        phys = 64 << 20
    budget = min((phys * 3) // 8, 48 << 20)      # ~24 MiB on v7x, 48 MiB on v5e/v6e
    per_lane = 2 * 4 * (d_model + cout)          # double-buffered in+out bytes / lane
    npad128 = _round_up(max(n_rows, 1), LANE)

    tn = min(2048, npad128)                      # large tiles: ~0.35 us/step overhead
    if tn * per_lane > budget:
        tn = max(LANE, (budget // per_lane) // LANE * LANE)
    # Prefer >= 2 grid steps when the batch allows, so ("parallel",) can feed
    # both v7x TensorCores (near-free on single-core v5e/v6e).
    if npad128 >= 2 * LANE:
        tn = min(tn, max(LANE, (npad128 // 2) // LANE * LANE))

    vmem_limit = int(min(phys // 2, max(32 << 20, 4 * tn * per_lane)))
    return tn, vmem_limit


def kan_fused_forward(xT, cT, sbT, addT, *, k, knots, h, tn=None):
    """out[c, n] = sum_j( sbT[j]*silu(xT[j,n]) + spline_j(xT[j,n]) ) + addT[c]."""
    D, N = xT.shape
    Cout = addT.shape[0]
    auto_tn, vmem_limit = _choose_tiling(N, D, Cout)
    if tn is None:
        tn = auto_tn
    assert tn % LANE == 0

    Npad = _round_up(N, tn)
    if Npad != N:
        # TODO(synk): a masked tail store would avoid this host-side pad copy;
        # padded lanes run harmlessly through the finite-constant spline.
        xT = jnp.pad(xT, ((0, 0), (0, Npad - N)))

    out = pl.pallas_call(
        make_kan_fused_kernel(k, knots, h, Cout, D),
        out_shape=jax.ShapeDtypeStruct((Cout, Npad), jnp.float32),
        grid=(Npad // tn,),
        in_specs=[
            pl.BlockSpec((D, tn), lambda i: (0, i)),      # x tile (batch on lanes)
            pl.BlockSpec(cT.shape, lambda i: (0, 0)),     # folded spline coefs
            pl.BlockSpec(sbT.shape, lambda i: (0, 0)),    # folded base scale
            pl.BlockSpec(addT.shape, lambda i: (0, 0)),   # additive column
        ],
        out_specs=pl.BlockSpec((Cout, tn), lambda i: (0, i)),
        compiler_params=pltpu.CompilerParams(
            dimension_semantics=("parallel",),
            vmem_limit_bytes=vmem_limit),
    )(xT, cT, sbT, addT)
    return out[:, :N]                                     # drop padded lanes


# ----------------------------------------------------------------------------
# Parameter construction (forward semantics of pykan KAN([d_model, 1]))
# ----------------------------------------------------------------------------
def make_extended_grid(D, G, k, grid_range=(-1.0, 1.0)):
    lo, hi = grid_range
    pts = jnp.linspace(lo, hi, G + 1)
    h = (hi - lo) / G
    ext = jnp.concatenate(
        [pts[0] - h * jnp.arange(k, 0, -1), pts, pts[-1] + h * jnp.arange(1, k + 1)]
    ).astype(jnp.float32)                                 # (G + 2k + 1,)
    gT = jnp.tile(ext[None, :], (D, 1))                   # (D, Gext) for the reference
    knots = tuple(float(v) for v in np.asarray(ext))      # exact f32 values as scalars
    return gT, knots, float(h)


def init_kan_encoder_params(key, D, G, k, noise_scale=0.1, noise_scale_base=0.1):
    # Deterministic synthetic init with the correct shapes (not pykan's
    # curve2coef noise fit, but the same forward semantics).
    k1, k2 = jax.random.split(key)
    gT, knots, h = make_extended_grid(D, G, k)
    coef = jax.random.normal(k1, (D, G + k), jnp.float32) * noise_scale / G
    sb = (1.0 / jnp.sqrt(D)
          + (jax.random.uniform(k2, (D,), jnp.float32) * 2.0 - 1.0) * noise_scale_base)
    sp = jnp.ones((D,), jnp.float32)                      # scale_sp init = 1.0
    mask = jnp.ones((D,), jnp.float32)                    # activation mask = 1
    bias = jnp.float32(0.0)                               # pykan bias init = 0
    return dict(gT=gT, knots=knots, h=h, coef=coef, sb=sb, sp=sp, mask=mask, bias=bias)


def fold_kan_params(raw):
    """Fold mask/scale_sp into the coefficients and mask/scale_base into one
    per-feature column; knots/reciprocals are baked into the kernel."""
    cT = (raw["coef"] * (raw["mask"] * raw["sp"])[:, None]).astype(jnp.float32)
    sbT = (raw["mask"] * raw["sb"])[:, None].astype(jnp.float32)
    return cT, sbT
# TODO(synk): update_grid_from_samples would make the grid non-uniform and
# per-feature; that path needs per-feature knot/reciprocal operands with a
# where(diff==0, 0, 1/diff) guard (Cox-de Boor 0/0 -> 0 convention).


# ----------------------------------------------------------------------------
# Pure-JAX reference (unfolded params, explicit divisions, exact sigmoid)
# ----------------------------------------------------------------------------
def kan_encoder_ref(x, raw, *, k):
    g = raw["gT"].T                                       # (Gext, D)
    coef, sb, sp, mask, bias = raw["coef"], raw["sb"], raw["sp"], raw["mask"], raw["bias"]
    base = x * jax.nn.sigmoid(x)
    n0 = g.shape[0] - 1
    B = [((x >= g[i]) & (x < g[i + 1])).astype(jnp.float32) for i in range(n0)]
    for kk in range(1, k + 1):
        B = [
            (x - g[i]) / (g[i + kk] - g[i]) * B[i]
            + (g[i + kk + 1] - x) / (g[i + kk + 1] - g[i + 1]) * B[i + 1]
            for i in range(len(B) - 1)
        ]
    spline = sum(B[i] * coef[:, i] for i in range(len(B)))
    y = mask * (sb * base + sp * spline)
    return jnp.sum(y, axis=1) + bias                      # (N,)


# ----------------------------------------------------------------------------
# Model
# ----------------------------------------------------------------------------
class ClassVecInteractorPallas:
    def __init__(self, grid, k, n_classes, d_model, key):
        self.G, self.k = grid, k
        k1, k2, k3 = jax.random.split(key, 3)
        self.input_raw = init_kan_encoder_params(k1, d_model, grid, k)
        self.classifier_raw = init_kan_encoder_params(k2, d_model, grid, k)
        # torch init is zeros when w_path is None; use small deterministic
        # random values here so the spline kernel path is actually exercised.
        self.classifier = jax.random.uniform(
            k3, (n_classes, d_model), jnp.float32, minval=-0.8, maxval=0.8)

        self.input_cT, self.input_sbT = fold_kan_params(self.input_raw)
        cls_cT, cls_sbT = fold_kan_params(self.classifier_raw)

        # Classifier branch is constant across forwards: run it once through
        # the same fused kernel (Cout=1) and cache its logits.  Both biases
        # are folded into the cached additive column.
        bias_c = jnp.full((1, 1), self.classifier_raw["bias"], jnp.float32)
        c_logits = kan_fused_forward(
            self.classifier.T, cls_cT, cls_sbT, bias_c,
            k=k, knots=self.classifier_raw["knots"], h=self.classifier_raw["h"])  # (1, C)
        self.addT = (c_logits.reshape(n_classes, 1)
                     + self.input_raw["bias"]).astype(jnp.float32)                # (C, 1)

    def forward(self, x):
        out_T = kan_fused_forward(
            x.T, self.input_cT, self.input_sbT, self.addT,
            k=self.k, knots=self.input_raw["knots"], h=self.input_raw["h"])        # (C, B)
        # TODO(synk): downstream consumers could keep the lane-dense (C, B)
        # layout and skip this small transpose.
        return out_T.T                                                             # (B, C)

    def forward_ref(self, x):
        xl = kan_encoder_ref(x, self.input_raw, k=self.k)                          # (B,)
        cl = kan_encoder_ref(self.classifier, self.classifier_raw, k=self.k)       # (C,)
        return xl[:, None] + cl[None, :]                                           # (B, C)


# TODO(synk): training / update_grid_from_samples / plot / checkpoint methods of
# the original module are host-side orchestration, not kernels, and are omitted.

# ----------------------------------------------------------------------------
if __name__ == "__main__":
    key = jax.random.PRNGKey(0)
    kx, kp = jax.random.split(key)

    batch, d_model, n_classes, G, korder = 8, 32, 10, 5, 3
    x = jax.random.uniform(kx, (batch, d_model), jnp.float32, minval=-0.9, maxval=0.9)

    model = ClassVecInteractorPallas(grid=G, k=korder, n_classes=n_classes,
                                     d_model=d_model, key=kp)

    out = jax.block_until_ready(model.forward(x))
    ref = model.forward_ref(x)

    # Tolerance reflects the approximate EUP reciprocal used inside the SiLU
    # (a few 1e-4 relative per feature, summed over d_model features).
    np.testing.assert_allclose(np.asarray(out), np.asarray(ref), rtol=5e-3, atol=5e-3)
    assert out.shape == (batch, n_classes)

    print("KERNEL_OK")
</pallas_src>

<mosaic_0001>
module attributes {stable_mosaic.version = 11 : i64} {
  func.func @kernel(%arg0: i32, %arg1: memref<32x128xf32, #tpu.memory_space<vmem>>, %arg2: memref<32x8xf32, #tpu.memory_space<vmem>>, %arg3: memref<32x1xf32, #tpu.memory_space<vmem>>, %arg4: memref<1x1xf32, #tpu.memory_space<vmem>>, %arg5: memref<1x128xf32, #tpu.memory_space<vmem>>) attributes {dimension_semantics = [#tpu.dimension_semantics<parallel>], iteration_bounds = array<i64: 1>, scalar_prefetch = 0 : i64, scratch_operands = 0 : i64, tpu.core_type = #tpu.core_type<tc>, window_params = [{transform_indices = @transform_0, window_bounds = array<i64: 32, 128>}, {pipeline_mode = #tpu.pipeline_mode<synchronous>, transform_indices = @transform_1, window_bounds = array<i64: 32, 8>}, {pipeline_mode = #tpu.pipeline_mode<synchronous>, transform_indices = @transform_2, window_bounds = array<i64: 32, 1>}, {pipeline_mode = #tpu.pipeline_mode<synchronous>, transform_indices = @transform_3, window_bounds = array<i64: 1, 1>}, {transform_indices = @transform_4, window_bounds = array<i64: 1, 128>}]} {
    %c0 = arith.constant 0 : index
    %c0_0 = arith.constant 0 : index
    %0 = vector.load %arg2[%c0, %c0_0] : memref<32x8xf32, #tpu.memory_space<vmem>>, vector<32x8xf32>
    %c0_1 = arith.constant 0 : index
    %c0_2 = arith.constant 0 : index
    %1 = vector.load %arg3[%c0_1, %c0_2] : memref<32x1xf32, #tpu.memory_space<vmem>>, vector<32x1xf32>
    %c0_3 = arith.constant 0 : index
    %c0_4 = arith.constant 0 : index
    %2 = vector.load %arg4[%c0_3, %c0_4] : memref<1x1xf32, #tpu.memory_space<vmem>>, vector<1x1xf32>
    %cst = arith.constant 1.000000e+00 : f32
    %3 = vector.broadcast %cst : f32 to vector<1x32xf32>
    %c0_i32 = arith.constant 0 : i32
    %c1_i32 = arith.constant 1 : i32
    %4 = arith.muli %c0_i32, %c1_i32 : i32
    %c0_i32_5 = arith.constant 0 : i32
    %5 = arith.addi %c0_i32_5, %4 : i32
    %c128_i32 = arith.constant 128 : i32
    %6 = arith.muli %5, %c128_i32 : i32
    %7 = tpu.assume_multiple %6, 128 : i32
    %c0_6 = arith.constant 0 : index
    %8 = arith.index_cast %7 : i32 to index
    %9 = vector.load %arg1[%c0_6, %8] : memref<32x128xf32, #tpu.memory_space<vmem>>, vector<32x128xf32>
    %cst_7 = arith.constant 0.000000e+00 : f32
    %10 = vector.broadcast %cst_7 : f32 to vector<32x128xf32>
    %11 = arith.subf %10, %9 : vector<32x128xf32>
    %12 = math.exp %11 : vector<32x128xf32>
    %cst_8 = arith.constant 1.000000e+00 : f32
    %13 = vector.broadcast %cst_8 : f32 to vector<32x128xf32>
    %14 = arith.addf %13, %12 : vector<32x128xf32>
    %15 = tpu.reciprocal %14 {approx = true} : vector<32x128xf32> -> vector<32x128xf32>
    %16 = arith.mulf %9, %15 : vector<32x128xf32>
    %cst_9 = arith.constant -2.200000e+00 : f32
    %17 = vector.broadcast %cst_9 : f32 to vector<32x128xf32>
    %18 = arith.cmpf oge, %9, %17 : vector<32x128xf32>
    %19 = arith.extui %18 : vector<32x128xi1> to vector<32x128xi32>
    %20 = arith.sitofp %19 : vector<32x128xi32> to vector<32x128xf32>
    %cst_10 = arith.constant -1.800000e+00 : f32
    %21 = vector.broadcast %cst_10 : f32 to vector<32x128xf32>
    %22 = arith.cmpf oge, %9, %21 : vector<32x128xf32>
    %23 = arith.extui %22 : vector<32x128xi1> to vector<32x128xi32>
    %24 = arith.sitofp %23 : vector<32x128xi32> to vector<32x128xf32>
    %cst_11 = arith.constant -1.400000e+00 : f32
    %25 = vector.broadcast %cst_11 : f32 to vector<32x128xf32>
    %26 = arith.cmpf oge, %9, %25 : vector<32x128xf32>
    %27 = arith.extui %26 : vector<32x128xi1> to vector<32x128xi32>
    %28 = arith.sitofp %27 : vector<32x128xi32> to vector<32x128xf32>
    %cst_12 = arith.constant -1.000000e+00 : f32
    %29 = vector.broadcast %cst_12 : f32 to vector<32x128xf32>
    %30 = arith.cmpf oge, %9, %29 : vector<32x128xf32>
    %31 = arith.extui %30 : vector<32x128xi1> to vector<32x128xi32>
    %32 = arith.sitofp %31 : vector<32x128xi32> to vector<32x128xf32>
    %cst_13 = arith.constant -6.000000e-01 : f32
    %33 = vector.broadcast %cst_13 : f32 to vector<32x128xf32>
    %34 = arith.cmpf oge, %9, %33 : vector<32x128xf32>
    %35 = arith.extui %34 : vector<32x128xi1> to vector<32x128xi32>
    %36 = arith.sitofp %35 : vector<32x128xi32> to vector<32x128xf32>
    %cst_14 = arith.constant -0.200000018 : f32
    %37 = vector.broadcast %cst_14 : f32 to vector<32x128xf32>
    %38 = arith.cmpf oge, %9, %37 : vector<32x128xf32>
    %39 = arith.extui %38 : vector<32x128xi1> to vector<32x128xi32>
    %40 = arith.sitofp %39 : vector<32x128xi32> to vector<32x128xf32>
    %cst_15 = arith.constant 0.200000033 : f32
    %41 = vector.broadcast %cst_15 : f32 to vector<32x128xf32>
    %42 = arith.cmpf oge, %9, %41 : vector<32x128xf32>
    %43 = arith.extui %42 : vector<32x128xi1> to vector<32x128xi32>
    %44 = arith.sitofp %43 : vector<32x128xi32> to vector<32x128xf32>
    %cst_16 = arith.constant 6.000000e-01 : f32
    %45 = vector.broadcast %cst_16 : f32 to vector<32x128xf32>
    %46 = arith.cmpf oge, %9, %45 : vector<32x128xf32>
    %47 = arith.extui %46 : vector<32x128xi1> to vector<32x128xi32>
    %48 = arith.sitofp %47 : vector<32x128xi32> to vector<32x128xf32>
    %cst_17 = arith.constant 1.000000e+00 : f32
    %49 = vector.broadcast %cst_17 : f32 to vector<32x128xf32>
    %50 = arith.cmpf oge, %9, %49 : vector<32x128xf32>
    %51 = arith.extui %50 : vector<32x128xi1> to vector<32x128xi32>
    %52 = arith.sitofp %51 : vector<32x128xi32> to vector<32x128xf32>
    %cst_18 = arith.constant 1.400000e+00 : f32
    %53 = vector.broadcast %cst_18 : f32 to vector<32x128xf32>
    %54 = arith.cmpf oge, %9, %53 : vector<32x128xf32>
    %55 = arith.extui %54 : vector<32x128xi1> to vector<32x128xi32>
    %56 = arith.sitofp %55 : vector<32x128xi32> to vector<32x128xf32>
    %cst_19 = arith.constant 1.800000e+00 : f32
    %57 = vector.broadcast %cst_19 : f32 to vector<32x128xf32>
    %58 = arith.cmpf oge, %9, %57 : vector<32x128xf32>
    %59 = arith.extui %58 : vector<32x128xi1> to vector<32x128xi32>
    %60 = arith.sitofp %59 : vector<32x128xi32> to vector<32x128xf32>
    %cst_20 = arith.constant 2.200000e+00 : f32
    %61 = vector.broadcast %cst_20 : f32 to vector<32x128xf32>
    %62 = arith.cmpf oge, %9, %61 : vector<32x128xf32>
    %63 = arith.extui %62 : vector<32x128xi1> to vector<32x128xi32>
    %64 = arith.sitofp %63 : vector<32x128xi32> to vector<32x128xf32>
    %65 = arith.subf %20, %24 : vector<32x128xf32>
    %66 = arith.subf %24, %28 : vector<32x128xf32>
    %67 = arith.subf %28, %32 : vector<32x128xf32>
    %68 = arith.subf %32, %36 : vector<32x128xf32>
    %69 = arith.subf %36, %40 : vector<32x128xf32>
    %70 = arith.subf %40, %44 : vector<32x128xf32>
    %71 = arith.subf %44, %48 : vector<32x128xf32>
    %72 = arith.subf %48, %52 : vector<32x128xf32>
    %73 = arith.subf %52, %56 : vector<32x128xf32>
    %74 = arith.subf %56, %60 : vector<32x128xf32>
    %75 = arith.subf %60, %64 : vector<32x128xf32>
    %cst_21 = arith.constant -2.200000e+00 : f32
    %76 = vector.broadcast %cst_21 : f32 to vector<32x128xf32>
    %77 = arith.subf %9, %76 : vector<32x128xf32>
    %cst_22 = arith.constant 2.500000e+00 : f32
    %78 = vector.broadcast %cst_22 : f32 to vector<32x128xf32>
    %79 = arith.mulf %77, %78 : vector<32x128xf32>
    %cst_23 = arith.constant -1.800000e+00 : f32
    %80 = vector.broadcast %cst_23 : f32 to vector<32x128xf32>
    %81 = arith.subf %9, %80 : vector<32x128xf32>
    %cst_24 = arith.constant 2.500000e+00 : f32
    %82 = vector.broadcast %cst_24 : f32 to vector<32x128xf32>
    %83 = arith.mulf %81, %82 : vector<32x128xf32>
    %cst_25 = arith.constant -1.400000e+00 : f32
    %84 = vector.broadcast %cst_25 : f32 to vector<32x128xf32>
    %85 = arith.subf %9, %84 : vector<32x128xf32>
    %cst_26 = arith.constant 2.500000e+00 : f32
    %86 = vector.broadcast %cst_26 : f32 to vector<32x128xf32>
    %87 = arith.mulf %85, %86 : vector<32x128xf32>
    %cst_27 = arith.constant -1.000000e+00 : f32
    %88 = vector.broadcast %cst_27 : f32 to vector<32x128xf32>
    %89 = arith.subf %9, %88 : vector<32x128xf32>
    %cst_28 = arith.constant 2.500000e+00 : f32
    %90 = vector.broadcast %cst_28 : f32 to vector<32x128xf32>
    %91 = arith.mulf %89, %90 : vector<32x128xf32>
    %cst_29 = arith.constant -6.000000e-01 : f32
    %92 = vector.broadcast %cst_29 : f32 to vector<32x128xf32>
    %93 = arith.subf %9, %92 : vector<32x128xf32>
    %cst_30 = arith.constant 2.500000e+00 : f32
    %94 = vector.broadcast %cst_30 : f32 to vector<32x128xf32>
    %95 = arith.mulf %93, %94 : vector<32x128xf32>
    %cst_31 = arith.constant -0.200000018 : f32
    %96 = vector.broadcast %cst_31 : f32 to vector<32x128xf32>
    %97 = arith.subf %9, %96 : vector<32x128xf32>
    %cst_32 = arith.constant 2.500000e+00 : f32
    %98 = vector.broadcast %cst_32 : f32 to vector<32x128xf32>
    %99 = arith.mulf %97, %98 : vector<32x128xf32>
    %cst_33 = arith.constant 0.200000033 : f32
    %100 = vector.broadcast %cst_33 : f32 to vector<32x128xf32>
    %101 = arith.subf %9, %100 : vector<32x128xf32>
    %cst_34 = arith.constant 2.500000e+00 : f32
    %102 = vector.broadcast %cst_34 : f32 to vector<32x128xf32>
    %103 = arith.mulf %101, %102 : vector<32x128xf32>
    %cst_35 = arith.constant 6.000000e-01 : f32
    %104 = vector.broadcast %cst_35 : f32 to vector<32x128xf32>
    %105 = arith.subf %9, %104 : vector<32x128xf32>
    %cst_36 = arith.constant 2.500000e+00 : f32
    %106 = vector.broadcast %cst_36 : f32 to vector<32x128xf32>
    %107 = arith.mulf %105, %106 : vector<32x128xf32>
    %cst_37 = arith.constant 1.000000e+00 : f32
    %108 = vector.broadcast %cst_37 : f32 to vector<32x128xf32>
    %109 = arith.subf %9, %108 : vector<32x128xf32>
    %cst_38 = arith.constant 2.500000e+00 : f32
    %110 = vector.broadcast %cst_38 : f32 to vector<32x128xf32>
    %111 = arith.mulf %109, %110 : vector<32x128xf32>
    %cst_39 = arith.constant 1.400000e+00 : f32
    %112 = vector.broadcast %cst_39 : f32 to vector<32x128xf32>
    %113 = arith.subf %9, %112 : vector<32x128xf32>
    %cst_40 = arith.constant 2.500000e+00 : f32
    %114 = vector.broadcast %cst_40 : f32 to vector<32x128xf32>
    %115 = arith.mulf %113, %114 : vector<32x128xf32>
    %cst_41 = arith.constant 1.800000e+00 : f32
    %116 = vector.broadcast %cst_41 : f32 to vector<32x128xf32>
    %117 = arith.subf %9, %116 : vector<32x128xf32>
    %cst_42 = arith.constant 2.500000e+00 : f32
    %118 = vector.broadcast %cst_42 : f32 to vector<32x128xf32>
    %119 = arith.mulf %117, %118 : vector<32x128xf32>
    %120 = arith.mulf %79, %65 : vector<32x128xf32>
    %cst_43 = arith.constant 1.000000e+00 : f32
    %121 = vector.broadcast %cst_43 : f32 to vector<32x128xf32>
    %122 = arith.subf %121, %83 : vector<32x128xf32>
    %123 = arith.mulf %122, %66 : vector<32x128xf32>
    %124 = arith.addf %120, %123 : vector<32x128xf32>
    %125 = arith.mulf %83, %66 : vector<32x128xf32>
    %cst_44 = arith.constant 1.000000e+00 : f32
    %126 = vector.broadcast %cst_44 : f32 to vector<32x128xf32>
    %127 = arith.subf %126, %87 : vector<32x128xf32>
    %128 = arith.mulf %127, %67 : vector<32x128xf32>
    %129 = arith.addf %125, %128 : vector<32x128xf32>
    %130 = arith.mulf %87, %67 : vector<32x128xf32>
    %cst_45 = arith.constant 1.000000e+00 : f32
    %131 = vector.broadcast %cst_45 : f32 to vector<32x128xf32>
    %132 = arith.subf %131, %91 : vector<32x128xf32>
    %133 = arith.mulf %132, %68 : vector<32x128xf32>
    %134 = arith.addf %130, %133 : vector<32x128xf32>
    %135 = arith.mulf %91, %68 : vector<32x128xf32>
    %cst_46 = arith.constant 1.000000e+00 : f32
    %136 = vector.broadcast %cst_46 : f32 to vector<32x128xf32>
    %137 = arith.subf %136, %95 : vector<32x128xf32>
    %138 = arith.mulf %137, %69 : vector<32x128xf32>
    %139 = arith.addf %135, %138 : vector<32x128xf32>
    %140 = arith.mulf %95, %69 : vector<32x128xf32>
    %cst_47 = arith.constant 1.000000e+00 : f32
    %141 = vector.broadcast %cst_47 : f32 to vector<32x128xf32>
    %142 = arith.subf %141, %99 : vector<32x128xf32>
    %143 = arith.mulf %142, %70 : vector<32x128xf32>
    %144 = arith.addf %140, %143 : vector<32x128xf32>
    %145 = arith.mulf %99, %70 : vector<32x128xf32>
    %cst_48 = arith.constant 1.000000e+00 : f32
    %146 = vector.broadcast %cst_48 : f32 to vector<32x128xf32>
    %147 = arith.subf %146, %103 : vector<32x128xf32>
    %148 = arith.mulf %147, %71 : vector<32x128xf32>
    %149 = arith.addf %145, %148 : vector<32x128xf32>
    %150 = arith.mulf %103, %71 : vector<32x128xf32>
    %cst_49 = arith.constant 1.000000e+00 : f32
    %151 = vector.broadcast %cst_49 : f32 to vector<32x128xf32>
    %152 = arith.subf %151, %107 : vector<32x128xf32>
    %153 = arith.mulf %152, %72 : vector<32x128xf32>
    %154 = arith.addf %150, %153 : vector<32x128xf32>
    %155 = arith.mulf %107, %72 : vector<32x128xf32>
    %cst_50 = arith.constant 1.000000e+00 : f32
    %156 = vector.broadcast %cst_50 : f32 to vector<32x128xf32>
    %157 = arith.subf %156, %111 : vector<32x128xf32>
    %158 = arith.mulf %157, %73 : vector<32x128xf32>
    %159 = arith.addf %155, %158 : vector<32x128xf32>
    %160 = arith.mulf %111, %73 : vector<32x128xf32>
    %cst_51 = arith.constant 1.000000e+00 : f32
    %161 = vector.broadcast %cst_51 : f32 to vector<32x128xf32>
    %162 = arith.subf %161, %115 : vector<32x128xf32>
    %163 = arith.mulf %162, %74 : vector<32x128xf32>
    %164 = arith.addf %160, %163 : vector<32x128xf32>
    %165 = arith.mulf %115, %74 : vector<32x128xf32>
    %cst_52 = arith.constant 1.000000e+00 : f32
    %166 = vector.broadcast %cst_52 : f32 to vector<32x128xf32>
    %167 = arith.subf %166, %119 : vector<32x128xf32>
    %168 = arith.mulf %167, %75 : vector<32x128xf32>
    %169 = arith.addf %165, %168 : vector<32x128xf32>
    %cst_53 = arith.constant -2.200000e+00 : f32
    %170 = vector.broadcast %cst_53 : f32 to vector<32x128xf32>
    %171 = arith.subf %9, %170 : vector<32x128xf32>
    %cst_54 = arith.constant 1.250000e+00 : f32
    %172 = vector.broadcast %cst_54 : f32 to vector<32x128xf32>
    %173 = arith.mulf %171, %172 : vector<32x128xf32>
    %cst_55 = arith.constant -1.800000e+00 : f32
    %174 = vector.broadcast %cst_55 : f32 to vector<32x128xf32>
    %175 = arith.subf %9, %174 : vector<32x128xf32>
    %cst_56 = arith.constant 1.250000e+00 : f32
    %176 = vector.broadcast %cst_56 : f32 to vector<32x128xf32>
    %177 = arith.mulf %175, %176 : vector<32x128xf32>
    %cst_57 = arith.constant -1.400000e+00 : f32
    %178 = vector.broadcast %cst_57 : f32 to vector<32x128xf32>
    %179 = arith.subf %9, %178 : vector<32x128xf32>
    %cst_58 = arith.constant 1.250000e+00 : f32
    %180 = vector.broadcast %cst_58 : f32 to vector<32x128xf32>
    %181 = arith.mulf %179, %180 : vector<32x128xf32>
    %cst_59 = arith.constant -1.000000e+00 : f32
    %182 = vector.broadcast %cst_59 : f32 to vector<32x128xf32>
    %183 = arith.subf %9, %182 : vector<32x128xf32>
    %cst_60 = arith.constant 1.250000e+00 : f32
    %184 = vector.broadcast %cst_60 : f32 to vector<32x128xf32>
    %185 = arith.mulf %183, %184 : vector<32x128xf32>
    %cst_61 = arith.constant -6.000000e-01 : f32
    %186 = vector.broadcast %cst_61 : f32 to vector<32x128xf32>
    %187 = arith.subf %9, %186 : vector<32x128xf32>
    %cst_62 = arith.constant 1.250000e+00 : f32
    %188 = vector.broadcast %cst_62 : f32 to vector<32x128xf32>
    %189 = arith.mulf %187, %188 : vector<32x128xf32>
    %cst_63 = arith.constant -0.200000018 : f32
    %190 = vector.broadcast %cst_63 : f32 to vector<32x128xf32>
    %191 = arith.subf %9, %190 : vector<32x128xf32>
    %cst_64 = arith.constant 1.250000e+00 : f32
    %192 = vector.broadcast %cst_64 : f32 to vector<32x128xf32>
    %193 = arith.mulf %191, %192 : vector<32x128xf32>
    %cst_65 = arith.constant 0.200000033 : f32
    %194 = vector.broadcast %cst_65 : f32 to vector<32x128xf32>
    %195 = arith.subf %9, %194 : vector<32x128xf32>
    %cst_66 = arith.constant 1.250000e+00 : f32
    %196 = vector.broadcast %cst_66 : f32 to vector<32x128xf32>
    %197 = arith.mulf %195, %196 : vector<32x128xf32>
    %cst_67 = arith.constant 6.000000e-01 : f32
    %198 = vector.broadcast %cst_67 : f32 to vector<32x128xf32>
    %199 = arith.subf %9, %198 : vector<32x128xf32>
    %cst_68 = arith.constant 1.250000e+00 : f32
    %200 = vector.broadcast %cst_68 : f32 to vector<32x128xf32>
    %201 = arith.mulf %199, %200 : vector<32x128xf32>
    %cst_69 = arith.constant 1.000000e+00 : f32
    %202 = vector.broadcast %cst_69 : f32 to vector<32x128xf32>
    %203 = arith.subf %9, %202 : vector<32x128xf32>
    %cst_70 = arith.constant 1.250000e+00 : f32
    %204 = vector.broadcast %cst_70 : f32 to vector<32x128xf32>
    %205 = arith.mulf %203, %204 : vector<32x128xf32>
    %cst_71 = arith.constant 1.400000e+00 : f32
    %206 = vector.broadcast %cst_71 : f32 to vector<32x128xf32>
    %207 = arith.subf %9, %206 : vector<32x128xf32>
    %cst_72 = arith.constant 1.250000e+00 : f32
    %208 = vector.broadcast %cst_72 : f32 to vector<32x128xf32>
    %209 = arith.mulf %207, %208 : vector<32x128xf32>
    %210 = arith.mulf %173, %124 : vector<32x128xf32>
    %cst_73 = arith.constant 1.000000e+00 : f32
    %211 = vector.broadcast %cst_73 : f32 to vector<32x128xf32>
    %212 = arith.subf %211, %177 : vector<32x128xf32>
    %213 = arith.mulf %212, %129 : vector<32x128xf32>
    %214 = arith.addf %210, %213 : vector<32x128xf32>
    %215 = arith.mulf %177, %129 : vector<32x128xf32>
    %cst_74 = arith.constant 1.000000e+00 : f32
    %216 = vector.broadcast %cst_74 : f32 to vector<32x128xf32>
    %217 = arith.subf %216, %181 : vector<32x128xf32>
    %218 = arith.mulf %217, %134 : vector<32x128xf32>
    %219 = arith.addf %215, %218 : vector<32x128xf32>
    %220 = arith.mulf %181, %134 : vector<32x128xf32>
    %cst_75 = arith.constant 1.000000e+00 : f32
    %221 = vector.broadcast %cst_75 : f32 to vector<32x128xf32>
    %222 = arith.subf %221, %185 : vector<32x128xf32>
    %223 = arith.mulf %222, %139 : vector<32x128xf32>
    %224 = arith.addf %220, %223 : vector<32x128xf32>
    %225 = arith.mulf %185, %139 : vector<32x128xf32>
    %cst_76 = arith.constant 1.000000e+00 : f32
    %226 = vector.broadcast %cst_76 : f32 to vector<32x128xf32>
    %227 = arith.subf %226, %189 : vector<32x128xf32>
    %228 = arith.mulf %227, %144 : vector<32x128xf32>
    %229 = arith.addf %225, %228 : vector<32x128xf32>
    %230 = arith.mulf %189, %144 : vector<32x128xf32>
    %cst_77 = arith.constant 1.000000e+00 : f32
    %231 = vector.broadcast %cst_77 : f32 to vector<32x128xf32>
    %232 = arith.subf %231, %193 : vector<32x128xf32>
    %233 = arith.mulf %232, %149 : vector<32x128xf32>
    %234 = arith.addf %230, %233 : vector<32x128xf32>
    %235 = arith.mulf %193, %149 : vector<32x128xf32>
    %cst_78 = arith.constant 1.000000e+00 : f32
    %236 = vector.broadcast %cst_78 : f32 to vector<32x128xf32>
    %237 = arith.subf %236, %197 : vector<32x128xf32>
    %238 = arith.mulf %237, %154 : vector<32x128xf32>
    %239 = arith.addf %235, %238 : vector<32x128xf32>
    %240 = arith.mulf %197, %154 : vector<32x128xf32>
    %cst_79 = arith.constant 1.000000e+00 : f32
    %241 = vector.broadcast %cst_79 : f32 to vector<32x128xf32>
    %242 = arith.subf %241, %201 : vector<32x128xf32>
    %243 = arith.mulf %242, %159 : vector<32x128xf32>
    %244 = arith.addf %240, %243 : vector<32x128xf32>
    %245 = arith.mulf %201, %159 : vector<32x128xf32>
    %cst_80 = arith.constant 1.000000e+00 : f32
    %246 = vector.broadcast %cst_80 : f32 to vector<32x128xf32>
    %247 = arith.subf %246, %205 : vector<32x128xf32>
    %248 = arith.mulf %247, %164 : vector<32x128xf32>
    %249 = arith.addf %245, %248 : vector<32x128xf32>
    %250 = arith.mulf %205, %164 : vector<32x128xf32>
    %cst_81 = arith.constant 1.000000e+00 : f32
    %251 = vector.broadcast %cst_81 : f32 to vector<32x128xf32>
    %252 = arith.subf %251, %209 : vector<32x128xf32>
    %253 = arith.mulf %252, %169 : vector<32x128xf32>
    %254 = arith.addf %250, %253 : vector<32x128xf32>
    %cst_82 = arith.constant -2.200000e+00 : f32
    %255 = vector.broadcast %cst_82 : f32 to vector<32x128xf32>
    %256 = arith.subf %9, %255 : vector<32x128xf32>
    %cst_83 = arith.constant 0.833333313 : f32
    %257 = vector.broadcast %cst_83 : f32 to vector<32x128xf32>
    %258 = arith.mulf %256, %257 : vector<32x128xf32>
    %cst_84 = arith.constant -1.800000e+00 : f32
    %259 = vector.broadcast %cst_84 : f32 to vector<32x128xf32>
    %260 = arith.subf %9, %259 : vector<32x128xf32>
    %cst_85 = arith.constant 0.833333313 : f32
    %261 = vector.broadcast %cst_85 : f32 to vector<32x128xf32>
    %262 = arith.mulf %260, %261 : vector<32x128xf32>
    %cst_86 = arith.constant -1.400000e+00 : f32
    %263 = vector.broadcast %cst_86 : f32 to vector<32x128xf32>
    %264 = arith.subf %9, %263 : vector<32x128xf32>
    %cst_87 = arith.constant 0.833333313 : f32
    %265 = vector.broadcast %cst_87 : f32 to vector<32x128xf32>
    %266 = arith.mulf %264, %265 : vector<32x128xf32>
    %cst_88 = arith.constant -1.000000e+00 : f32
    %267 = vector.broadcast %cst_88 : f32 to vector<32x128xf32>
    %268 = arith.subf %9, %267 : vector<32x128xf32>
    %cst_89 = arith.constant 0.833333313 : f32
    %269 = vector.broadcast %cst_89 : f32 to vector<32x128xf32>
    %270 = arith.mulf %268, %269 : vector<32x128xf32>
    %cst_90 = arith.constant -6.000000e-01 : f32
    %271 = vector.broadcast %cst_90 : f32 to vector<32x128xf32>
    %272 = arith.subf %9, %271 : vector<32x128xf32>
    %cst_91 = arith.constant 0.833333313 : f32
    %273 = vector.broadcast %cst_91 : f32 to vector<32x128xf32>
    %274 = arith.mulf %272, %273 : vector<32x128xf32>
    %cst_92 = arith.constant -0.200000018 : f32
    %275 = vector.broadcast %cst_92 : f32 to vector<32x128xf32>
    %276 = arith.subf %9, %275 : vector<32x128xf32>
    %cst_93 = arith.constant 0.833333313 : f32
    %277 = vector.broadcast %cst_93 : f32 to vector<32x128xf32>
    %278 = arith.mulf %276, %277 : vector<32x128xf32>
    %cst_94 = arith.constant 0.200000033 : f32
    %279 = vector.broadcast %cst_94 : f32 to vector<32x128xf32>
    %280 = arith.subf %9, %279 : vector<32x128xf32>
    %cst_95 = arith.constant 0.833333313 : f32
    %281 = vector.broadcast %cst_95 : f32 to vector<32x128xf32>
    %282 = arith.mulf %280, %281 : vector<32x128xf32>
    %cst_96 = arith.constant 6.000000e-01 : f32
    %283 = vector.broadcast %cst_96 : f32 to vector<32x128xf32>
    %284 = arith.subf %9, %283 : vector<32x128xf32>
    %cst_97 = arith.constant 0.833333313 : f32
    %285 = vector.broadcast %cst_97 : f32 to vector<32x128xf32>
    %286 = arith.mulf %284, %285 : vector<32x128xf32>
    %cst_98 = arith.constant 1.000000e+00 : f32
    %287 = vector.broadcast %cst_98 : f32 to vector<32x128xf32>
    %288 = arith.subf %9, %287 : vector<32x128xf32>
    %cst_99 = arith.constant 0.833333313 : f32
    %289 = vector.broadcast %cst_99 : f32 to vector<32x128xf32>
    %290 = arith.mulf %288, %289 : vector<32x128xf32>
    %291 = arith.mulf %258, %214 : vector<32x128xf32>
    %cst_100 = arith.constant 1.000000e+00 : f32
    %292 = vector.broadcast %cst_100 : f32 to vector<32x128xf32>
    %293 = arith.subf %292, %262 : vector<32x128xf32>
    %294 = arith.mulf %293, %219 : vector<32x128xf32>
    %295 = arith.addf %291, %294 : vector<32x128xf32>
    %296 = vector.extract_strided_slice %0 {offsets = [0, 0], sizes = [32, 1], strides = [1, 1]} : vector<32x8xf32> to vector<32x1xf32>
    %297 = vector.broadcast %296 : vector<32x1xf32> to vector<32x128xf32>
    %298 = arith.mulf %295, %297 : vector<32x128xf32>
    %299 = arith.mulf %262, %219 : vector<32x128xf32>
    %cst_101 = arith.constant 1.000000e+00 : f32
    %300 = vector.broadcast %cst_101 : f32 to vector<32x128xf32>
    %301 = arith.subf %300, %266 : vector<32x128xf32>
    %302 = arith.mulf %301, %224 : vector<32x128xf32>
    %303 = arith.addf %299, %302 : vector<32x128xf32>
    %304 = vector.extract_strided_slice %0 {offsets = [0, 1], sizes = [32, 1], strides = [1, 1]} : vector<32x8xf32> to vector<32x1xf32>
    %305 = vector.broadcast %304 : vector<32x1xf32> to vector<32x128xf32>
    %306 = arith.mulf %303, %305 : vector<32x128xf32>
    %307 = arith.addf %298, %306 : vector<32x128xf32>
    %308 = arith.mulf %266, %224 : vector<32x128xf32>
    %cst_102 = arith.constant 1.000000e+00 : f32
    %309 = vector.broadcast %cst_102 : f32 to vector<32x128xf32>
    %310 = arith.subf %309, %270 : vector<32x128xf32>
    %311 = arith.mulf %310, %229 : vector<32x128xf32>
    %312 = arith.addf %308, %311 : vector<32x128xf32>
    %313 = vector.extract_strided_slice %0 {offsets = [0, 2], sizes = [32, 1], strides = [1, 1]} : vector<32x8xf32> to vector<32x1xf32>
    %314 = vector.broadcast %313 : vector<32x1xf32> to vector<32x128xf32>
    %315 = arith.mulf %312, %314 : vector<32x128xf32>
    %316 = arith.addf %307, %315 : vector<32x128xf32>
    %317 = arith.mulf %270, %229 : vector<32x128xf32>
    %cst_103 = arith.constant 1.000000e+00 : f32
    %318 = vector.broadcast %cst_103 : f32 to vector<32x128xf32>
    %319 = arith.subf %318, %274 : vector<32x128xf32>
    %320 = arith.mulf %319, %234 : vector<32x128xf32>
    %321 = arith.addf %317, %320 : vector<32x128xf32>
    %322 = vector.extract_strided_slice %0 {offsets = [0, 3], sizes = [32, 1], strides = [1, 1]} : vector<32x8xf32> to vector<32x1xf32>
    %323 = vector.broadcast %322 : vector<32x1xf32> to vector<32x128xf32>
    %324 = arith.mulf %321, %323 : vector<32x128xf32>
    %325 = arith.addf %316, %324 : vector<32x128xf32>
    %326 = arith.mulf %274, %234 : vector<32x128xf32>
    %cst_104 = arith.constant 1.000000e+00 : f32
    %327 = vector.broadcast %cst_104 : f32 to vector<32x128xf32>
    %328 = arith.subf %327, %278 : vector<32x128xf32>
    %329 = arith.mulf %328, %239 : vector<32x128xf32>
    %330 = arith.addf %326, %329 : vector<32x128xf32>
    %331 = vector.extract_strided_slice %0 {offsets = [0, 4], sizes = [32, 1], strides = [1, 1]} : vector<32x8xf32> to vector<32x1xf32>
    %332 = vector.broadcast %331 : vector<32x1xf32> to vector<32x128xf32>
    %333 = arith.mulf %330, %332 : vector<32x128xf32>
    %334 = arith.addf %325, %333 : vector<32x128xf32>
    %335 = arith.mulf %278, %239 : vector<32x128xf32>
    %cst_105 = arith.constant 1.000000e+00 : f32
    %336 = vector.broadcast %cst_105 : f32 to vector<32x128xf32>
    %337 = arith.subf %336, %282 : vector<32x128xf32>
    %338 = arith.mulf %337, %244 : vector<32x128xf32>
    %339 = arith.addf %335, %338 : vector<32x128xf32>
    %340 = vector.extract_strided_slice %0 {offsets = [0, 5], sizes = [32, 1], strides = [1, 1]} : vector<32x8xf32> to vector<32x1xf32>
    %341 = vector.broadcast %340 : vector<32x1xf32> to vector<32x128xf32>
    %342 = arith.mulf %339, %341 : vector<32x128xf32>
    %343 = arith.addf %334, %342 : vector<32x128xf32>
    %344 = arith.mulf %282, %244 : vector<32x128xf32>
    %cst_106 = arith.constant 1.000000e+00 : f32
    %345 = vector.broadcast %cst_106 : f32 to vector<32x128xf32>
    %346 = arith.subf %345, %286 : vector<32x128xf32>
    %347 = arith.mulf %346, %249 : vector<32x128xf32>
    %348 = arith.addf %344, %347 : vector<32x128xf32>
    %349 = vector.extract_strided_slice %0 {offsets = [0, 6], sizes = [32, 1], strides = [1, 1]} : vector<32x8xf32> to vector<32x1xf32>
    %350 = vector.broadcast %349 : vector<32x1xf32> to vector<32x128xf32>
    %351 = arith.mulf %348, %350 : vector<32x128xf32>
    %352 = arith.addf %343, %351 : vector<32x128xf32>
    %353 = arith.mulf %286, %249 : vector<32x128xf32>
    %cst_107 = arith.constant 1.000000e+00 : f32
    %354 = vector.broadcast %cst_107 : f32 to vector<32x128xf32>
    %355 = arith.subf %354, %290 : vector<32x128xf32>
    %356 = arith.mulf %355, %254 : vector<32x128xf32>
    %357 = arith.addf %353, %356 : vector<32x128xf32>
    %358 = vector.extract_strided_slice %0 {offsets = [0, 7], sizes = [32, 1], strides = [1, 1]} : vector<32x8xf32> to vector<32x1xf32>
    %359 = vector.broadcast %358 : vector<32x1xf32> to vector<32x128xf32>
    %360 = arith.mulf %357, %359 : vector<32x128xf32>
    %361 = arith.addf %352, %360 : vector<32x128xf32>
    %362 = vector.broadcast %1 : vector<32x1xf32> to vector<32x128xf32>
    %363 = arith.mulf %362, %16 : vector<32x128xf32>
    %364 = arith.addf %363, %361 : vector<32x128xf32>
    %cst_108 = arith.constant dense<0.000000e+00> : vector<1x128xf32>
    %365 = tpu.matmul %3, %364, %cst_108 {dimension_numbers = #tpu.dot_dimension_numbers<[1], [0], [0], [1], [0, 0, 1, 1], [], []>} : vector<1x32xf32>, vector<32x128xf32>, vector<1x128xf32> -> vector<1x128xf32>
    %366 = vector.broadcast %2 : vector<1x1xf32> to vector<1x128xf32>
    %367 = arith.addf %365, %366 : vector<1x128xf32>
    %c0_109 = arith.constant 0 : index
    %368 = arith.index_cast %7 : i32 to index
    %369 = vector.load %arg5[%c0_109, %368] : memref<1x128xf32, #tpu.memory_space<vmem>>, vector<1x128xf32>
    tpu.vector_store %arg5[%c0_109, %368], %367 {strides = array<i32>} : memref<1x128xf32, #tpu.memory_space<vmem>>, vector<1x128xf32>,
    %c1_i32_110 = arith.constant 1 : i32
    return
  }
  func.func @transform_0(%arg0: i32) -> (i32, i32) {
    %c0_i32 = arith.constant 0 : i32
    %c0_i32_0 = arith.constant 0 : i32
    return %c0_i32, %arg0 : i32, i32
  }
  func.func @transform_1(%arg0: i32) -> (i32, i32) {
    %c0_i32 = arith.constant 0 : i32
    %c0_i32_0 = arith.constant 0 : i32
    %c0_i32_1 = arith.constant 0 : i32
    return %c0_i32, %c0_i32_0 : i32, i32
  }
  func.func @transform_2(%arg0: i32) -> (i32, i32) {
    %c0_i32 = arith.constant 0 : i32
    %c0_i32_0 = arith.constant 0 : i32
    %c0_i32_1 = arith.constant 0 : i32
    return %c0_i32, %c0_i32_0 : i32, i32
  }
  func.func @transform_3(%arg0: i32) -> (i32, i32) {
    %c0_i32 = arith.constant 0 : i32
    %c0_i32_0 = arith.constant 0 : i32
    %c0_i32_1 = arith.constant 0 : i32
    return %c0_i32, %c0_i32_0 : i32, i32
  }
  func.func @transform_4(%arg0: i32) -> (i32, i32) {
    %c0_i32 = arith.constant 0 : i32
    %c0_i32_0 = arith.constant 0 : i32
    return %c0_i32, %arg0 : i32, i32
  }
}

</mosaic_0001>

<bundles_post_ra>
// kernel: tpu_custom_call.1
= control target key start
LH: loop header
LB: loop body
LE: loop exit
PB: predicated region body
PF: predicated region fallthrough
CT: control target
= control target key end

     0   :  { %s2386_s0 = inlined_call_operand.vmem [shape: f32[32,128], index: 0, kind: input, shape index: {}]   ;;  %s2387_s1 = inlined_call_operand.vmem [shape: f32[32,8], index: 1, kind: input, shape index: {}]   ;;  %s2388_s2 = inlined_call_operand.vmem [shape: f32[32,1], index: 2, kind: input, shape index: {}]   ;;  %s2389_s3 = inlined_call_operand.<no memory space> [shape: f32[1,1], index: 3, kind: input, shape index: {}]   ;;  %s2390_s4 = inlined_call_operand.hbm [shape: f32[1,128], index: 4, kind: output, shape index: {}]  }
   0x1   :  { %v9_v0 = vstv %s2389_s3 }
   0x2   :  { %10 = vst [vmem:[#allocation2] sm:$0x1] %v9_v0 }
   0x3   :  { %v1325_v1 = vld [vmem:[%s2387_s1 + $0x10] sm:$0xff]  ;;  %v1330_v2 = vld [vmem:[%s2387_s1] sm:$0xff]  ;;  %v1283_v3 = vmov 1   ;;  %v2391_v4 = vmov 0  }
   0x4   :  { %1214 = vset.pattern.permute.xlu2 %v1283_v3  ;;  %1213 = vset.pattern.permute.xlu1 %v2391_v4 }
   0x5   :  { %11 = vsyncpa [#allocation4], 0  ;;  %1212 = vset.pattern.permute.xlu0 %v2391_v4  ;;  %741 = vperm.xlu1 %1213, %v1325_v1   ;;  %v1340_v5 = vld [vmem:[%s2387_s1 + $0x18] sm:$0xff]  ;;  %v1345_v6 = vld [vmem:[%s2387_s1 + $0x8] sm:$0xff]  ;;  %v1285_v7 = vmov 2   ;;  %v1286_v8 = vmov 3  }
   0x6   :  { %770 = vperm.xlu2 %1214, %v1330_v2   ;;  %731 = vperm.xlu0 %1212, %v1330_v2   ;;  %v1287_v9 = vmov 4   ;;  %v1288_v10 = vmov 6   ;;  %v1289_v11 = vmov 5   ;;  %v1290_v12 = vmov 7   ;;  %v1375_v13 = vld [vmem:[%s2386_s0] sm:$0xff]  ;;  %v1398_v21 = vld [vmem:[%s2386_s0 + $0x18] sm:$0xff] }
   0x7   :  { %2458 = vst [vmem:[#allocation6_spill] sm:$0xff] %v1375_v13  ;;  %vm69_vm0 = vcmp.ge.f32.partialorder %v1375_v13, -1.8  ;;  %vm81_vm1 = vcmp.ge.f32.partialorder %v1375_v13, -1.4  ;;  %vm93_vm2 = vcmp.ge.f32.partialorder %v1375_v13, -1.0 }
   0x8   :  { %vm105_vm3 = vcmp.ge.f32.partialorder %v1375_v13, -0.6  ;;  %v2392_v14 = vmov 0.0   ;;  %vm117_vm4 = vcmp.ge.f32.partialorder %v1375_v13, -0.20000002  ;;  %v1393_v20 = vadd.f32 1.0, %v1375_v13 }
   0x9   :  { %v1383_v15 = vsel %vm69_vm0, 1.0, %v2392_v14  ;;  %v1116_v16 = vsel %vm81_vm1, 1.0, %v2392_v14  ;;  %v1120_v17 = vsel %vm93_vm2, 1.0, %v2392_v14  ;;  %v1124_v18 = vsel %vm105_vm3, 1.0, %v2392_v14  ;;  %2460 = vst [vmem:[#allocation8_spill] sm:$0xff] %v1398_v21  ;;  %s1099_s22 = sshll.u32 %s2390_s4, 4  ;;  %s1100_s22 = int_to_ptr.hbm [resolvable:$true] %s1099_s22 }
   0xa   :  { %v1390_v19 = vadd.f32 1.4, %v1375_v13  ;;  %2459 = vst [vmem:[#allocation7_spill] sm:$0xff] %v1393_v20  ;;  %v1402_v22 = vsel %vm117_vm4, 1.0, %v2392_v14  ;;  %v1405_v23 = vsub.f32 %v1383_v15, %v1116_v16  ;;  %v209_v24 = vsub.f32 %v1116_v16, %v1120_v17 }
   0xb   :  { %2461 = vst [vmem:[#allocation9_spill] sm:$0xff] %v1402_v22  ;;  %vm72_vm5 = vcmp.ge.f32.partialorder %v1398_v21, -1.8  ;;  %v213_v25 = vsub.f32 %v1120_v17, %v1124_v18  ;;  %v1411_v26 = vadd.f32 0.6, %v1375_v13  ;;  %vm96_vm7 = vcmp.ge.f32.partialorder %v1398_v21, -1.0 }
   0xc   :  { %vm84_vm6 = vcmp.ge.f32.partialorder %v1398_v21, -1.4  ;;  %v1417_v27 = vadd.f32 1.8, %v1375_v13  ;;  %v265_v28 = vmul.f32 2.5, %v1390_v19  ;;  %v273_v29 = vmul.f32 2.5, %v1393_v20 }
   0xd   :  { %746 = vperm.xlu1 %1213, %v1340_v5   ;;  %2462 = vst [vmem:[#allocation10_spill] sm:$0xff] %v1411_v26  ;;  %vm108_vm8 = vcmp.ge.f32.partialorder %v1398_v21, -0.6  ;;  %v1423_v30 = vsel %vm72_vm5, 1.0, %v2392_v14  ;;  %vm120_vm9 = vcmp.ge.f32.partialorder %v1398_v21, -0.20000002  ;;  %v1453_v45 = vsub.f32 %v1124_v18, %v1402_v22 }
   0xe   :  { %782 = vperm.xlu2 %1214, %v1340_v5   ;;  %736 = vperm.xlu0 %1212, %v1345_v6   ;;  %v1427_v31 = vadd.f32 1.4, %v1398_v21  ;;  %v1430_v32 = vadd.f32 1.0, %v1398_v21  ;;  %v1119_v33 = vsel %vm84_vm6, 1.0, %v2392_v14  ;;  %v1123_v34 = vsel %vm96_vm7, 1.0, %v2392_v14 }
   0xf   :  { %v1435_v35 = vadd.f32 1.8, %v1398_v21  ;;  %v1438_v36 = vadd.f32 0.6, %v1398_v21  ;;  %v1441_v37 = vmul.f32 2.5, %v1411_v26  ;;  %v1127_v38 = vsel %vm108_vm8, 1.0, %v2392_v14 }
  0x10   :  { %v268_v39 = vmul.f32 2.5, %v1427_v31  ;;  %v276_v40 = vmul.f32 2.5, %v1430_v32  ;;  %v353_v41 = vsub.f32 1.0, %v265_v28  ;;  %v369_v42 = vsub.f32 1.0, %v273_v29  ;;  %2464 = vst [vmem:[#allocation12_spill] sm:$0xff] %v1453_v45 }
  0x11   :  { %2463 = vst [vmem:[#allocation11_spill] sm:$0xff] %v1441_v37  ;;  %v1447_v43 = vsel %vm120_vm9, 1.0, %v2392_v14  ;;  %v1450_v44 = vmul.f32 2.5, %v1438_v36  ;;  %v1456_v46 = vmul.f32 2.5, %v1417_v27  ;;  %v1459_v47 = vsub.f32 %v1423_v30, %v1119_v33 }
  0x12   :  { %v212_v48 = vsub.f32 %v1119_v33, %v1123_v34  ;;  %v216_v49 = vsub.f32 %v1123_v34, %v1127_v38  ;;  %v1462_v50 = vmul.f32 2.5, %v1435_v35  ;;  %v356_v51 = vsub.f32 1.0, %v268_v39  ;;  %v27_v33 = vld [vmem:[%s2388_s2 + $0x18] sm:$0xff] }
  0x13   :  { %v372_v52 = vsub.f32 1.0, %v276_v40  ;;  %v349_v53 = vmul.f32 %v1456_v46, %v1405_v23  ;;  %v501_v54 = vmul.f32 1.25, %v1390_v19  ;;  %v1469_v55 = vsub.f32 %v1127_v38, %v1447_v43 }
  0x14   :  { %v388_v56 = vsub.f32 1.0, %v1450_v44  ;;  %v357_v57 = vmul.f32 %v353_v41, %v209_v24  ;;  %v365_v58 = vmul.f32 %v265_v28, %v209_v24  ;;  %v373_v59 = vmul.f32 %v369_v42, %v213_v25  ;;  %v1493_v24 = vld [vmem:[%s2386_s0 + $0x8] sm:$0xff] }
  0x15   :  { %1216 = vset.pattern.permute.xlu1 %v1285_v7  ;;  %v385_v60 = vsub.f32 1.0, %v1441_v37  ;;  %v1475_v61 = vmul.f32 1.25, %v1417_v27  ;;  %v1478_v62 = vmul.f32 1.25, %v1393_v20  ;;  %v504_v63 = vmul.f32 1.25, %v1427_v31  ;;  %2466 = vst [vmem:[#allocation14_spill] sm:$0xff] %v1493_v24 }
  0x16   :  { %774 = vperm.xlu2 %1214, %v1345_v6   ;;  %1215 = vset.pattern.permute.xlu0 %v1283_v3  ;;  %v352_v0 = vmul.f32 %v1462_v50, %v1459_v47  ;;  %v368_v3 = vmul.f32 %v268_v39, %v212_v48  ;;  %v377_v16 = vadd.f32 %v373_v59, %v365_v58  ;;  %v553_v18 = vsub.f32 1.0, %v501_v54 }
  0x17   :  { %822 = vperm.xlu1 %1216, %v1340_v5   ;;  %778 = vperm.xlu0 %1215, %v1325_v1   ;;  %2465 = vst [vmem:[#allocation13_spill] sm:$0xff] %v1478_v62  ;;  %v389_v17 = vmul.f32 %v385_v60, %v1453_v45  ;;  %v569_v28 = vsub.f32 1.0, %v1478_v62  ;;  %vm70_vm10 = vcmp.ge.f32.partialorder %v1493_v24, -1.8  ;;  %vm82_vm11 = vcmp.ge.f32.partialorder %v1493_v24, -1.4 }
  0x18   :  { %vm94_vm12 = vcmp.ge.f32.partialorder %v1493_v24, -1.0  ;;  %v1509_v39 = vmul.f32 0.8333333, %v1390_v19  ;;  %v1515_v42 = vadd.f32 1.4, %v1493_v24 }
  0x19   :  { %v1524_v19 = vmul.f32 0.8333333, %v1427_v31  ;;  %vm106_vm13 = vcmp.ge.f32.partialorder %v1493_v24, -0.6  ;;  %v1540_v31 = vadd.f32 0.6, %v1493_v24 }
  0x1a   :  { %2467 = vst [vmem:[#allocation15_spill] sm:$0xff] %v1509_v39  ;;  %vm118_vm14 = vcmp.ge.f32.partialorder %v1493_v24, -0.20000002  ;;  %v1648_v22 = vmul.f32 0.8333333, %v1515_v42 }
  0x1b   :  { %2469 = vst [vmem:[#allocation17_spill] sm:$0xff] %v1524_v19  ;;  %vm57_vm4 = vcmp.ge.f32.partialorder %v1375_v13, -2.2  ;;  %vm132_vm5 = vcmp.ge.f32.partialorder %v1398_v21, 0.20000003 }
  0x1c   :  { %2472 = vst [vmem:[#allocation20_spill] sm:$0xff] %v1540_v31  ;;  %vm144_vm6 = vcmp.ge.f32.partialorder %v1398_v21, 0.6  ;;  %vm60_vm7 = vcmp.ge.f32.partialorder %v1398_v21, -2.2 }
  0x1e   :  { %1217 = vset.pattern.permute.xlu2 %v1286_v8 }
  0x1f   :  { %818 = vperm.xlu1 %1216, %v1325_v1   ;;  %862 = vperm.xlu2 %1217, %v1340_v5  }
  0x20   :  { %1218 = vset.pattern.permute.xlu0 %v1285_v7 }
  0x21   :  { %814 = vperm.xlu0 %1218, %v1345_v6  }
  0x27   :  { %1219 = vset.pattern.permute.xlu1 %v1286_v8  ;;  %1220 = vset.pattern.permute.xlu2 %v1287_v9 }
  0x28   :  { %858 = vperm.xlu1 %1219, %v1325_v1   ;;  %902 = vperm.xlu2 %1220, %v1340_v5  }
  0x29   :  { %1223 = vset.pattern.permute.xlu0 %v1287_v9 }
  0x2a   :  { %898 = vperm.xlu0 %1223, %v1325_v1  }
  0x30   :  { %1221 = vset.pattern.permute.xlu1 %v1285_v7  ;;  %1222 = vset.pattern.permute.xlu2 %v1286_v8  ;;  %v384_v7 = vmul.f32 %v276_v40, %v216_v49  ;;  %v392_v8 = vmul.f32 %v388_v56, %v1469_v55  ;;  %v1534_v56 = vadd.f32 1.0, %v1493_v24 }
  0x31   :  { %810 = vperm.xlu1 %1221, %v1330_v2   ;;  %854 = vperm.xlu2 %1222, %v1345_v6  }
  0x32   :  { %1227 = vset.pattern.permute.xlu0 %v1288_v10  ;;  %v1511_v40 = vadd.f32 %v392_v8, %v384_v7  ;;  %2471 = vst [vmem:[#allocation19_spill] sm:$0xff] %v1534_v56  ;;  %v1552_v7 = vmul.f32 0.8333333, %v1435_v35  ;;  %v760_v8 = vsub.f32 1.0, %v1524_v19 }
  0x33   :  { %982 = vperm.xlu0 %1227, %v1340_v5  }
  0x39   :  { %1224 = vset.pattern.permute.xlu1 %v1289_v11  ;;  %850 = vperm.xlu2 %1222, %v1330_v2  }
  0x3a   :  { %942 = vperm.xlu1 %1224, %v1340_v5  }
  0x3b   :  { %1230 = vset.pattern.permute.xlu0 %v1289_v11 }
  0x3c   :  { %930 = vperm.xlu0 %1230, %v1330_v2  }
  0x41   :  { %1226 = vset.pattern.permute.xlu2 %v1289_v11  ;;  %v1487_v11 = vadd.f32 %v357_v57, %v349_v53  ;;  %v1121_v53 = vsel %vm94_vm12, 1.0, %v2392_v14 }
  0x42   :  { %1225 = vset.pattern.permute.xlu1 %v1287_v9  ;;  %938 = vperm.xlu2 %1226, %v1325_v1   ;;  %v1485_v9 = vmul.f32 1.25, %v1430_v32 }
  0x43   :  { %894 = vperm.xlu1 %1225, %v1345_v6  }
  0x44   :  { %1233 = vset.pattern.permute.xlu0 %v1290_v12  ;;  %v572_v41 = vsub.f32 1.0, %v1485_v9 }
  0x45   :  { %1014 = vperm.xlu0 %1233, %v1345_v6  }
  0x46   :  { %v576_v60 = vmul.f32 %v572_v41, %v1511_v40 }
  0x4a   :  { %934 = vperm.xlu2 %1226, %v1345_v6  }
  0x4b   :  { %890 = vperm.xlu1 %1225, %v1330_v2  }
  0x4d   :  { %1236 = vset.pattern.permute.xlu0 %v2391_v4 }
  0x52   :  { %1229 = vset.pattern.permute.xlu2 %v1290_v12 }
  0x53   :  { %1228 = vset.pattern.permute.xlu1 %v1288_v10  ;;  %1022 = vperm.xlu2 %1229, %v1340_v5   ;;  %v376_v5 = vmul.f32 %v372_v52, %v216_v49  ;;  %v549_v49 = vmul.f32 %v1475_v61, %v1487_v11  ;;  %v1117_v52 = vsel %vm82_vm11, 1.0, %v2392_v14 }
  0x54   :  { %978 = vperm.xlu1 %1228, %v1325_v1  }
  0x55   :  { %v380_v38 = vadd.f32 %v376_v5, %v368_v3  ;;  %v565_v5 = vmul.f32 %v501_v54, %v377_v16 }
  0x57   :  { %v568_v59 = vmul.f32 %v504_v63, %v380_v38 }
  0x5b   :  { %1018 = vperm.xlu2 %1229, %v1325_v1   ;;  %v360_v1 = vmul.f32 %v356_v51, %v212_v48  ;;  %v1529_v51 = vsel %vm70_vm10, 1.0, %v2392_v14 }
  0x5c   :  { %974 = vperm.xlu1 %1228, %v1345_v6   ;;  %v381_v6 = vmul.f32 %v273_v29, %v213_v25  ;;  %v1497_v25 = vmul.f32 1.25, %v1435_v35  ;;  %v556_v29 = vsub.f32 1.0, %v504_v63  ;;  %2470 = vst [vmem:[#allocation18_spill] sm:$0xff] %v1529_v51  ;;  %v1125_v63 = vsel %vm106_vm13, 1.0, %v2392_v14 }
  0x5d   :  { %v1503_v34 = vadd.f32 %v360_v1, %v352_v0  ;;  %v1544_v0 = vadd.f32 1.8, %v1493_v24  ;;  %v266_v1 = vmul.f32 2.5, %v1515_v42  ;;  %v1563_v54 = vsub.f32 %v1529_v51, %v1117_v52 }
  0x5e   :  { %v1519_v48 = vadd.f32 %v389_v17, %v381_v6  ;;  %v560_v58 = vmul.f32 %v556_v29, %v380_v38  ;;  %v274_v17 = vmul.f32 2.5, %v1534_v56  ;;  %v1568_v35 = vadd.f32 %v576_v60, %v568_v59 }
  0x5f   :  { %v552_v57 = vmul.f32 %v1497_v25, %v1503_v34  ;;  %2473 = vst [vmem:[#allocation21_spill] sm:$0xff] %v1563_v54  ;;  %v1574_v38 = vmul.f32 2.5, %v1544_v0  ;;  %v354_v41 = vsub.f32 1.0, %v266_v1  ;;  %v1704_v51 = vadd.f32 -0.20000003, %v1398_v21 }
  0x60   :  { %2468 = vst [vmem:[#allocation16_spill] sm:$0xff] %v1519_v48  ;;  %v573_v6 = vmul.f32 %v569_v28, %v1519_v48  ;;  %v1566_v28 = vmul.f32 2.5, %v1540_v31 }
  0x61   :  { %v1560_v29 = vadd.f32 %v560_v58, %v552_v57  ;;  %2476 = vst [vmem:[#allocation24_spill] sm:$0xff] %v1574_v38  ;;  %v757_v57 = vsub.f32 1.0, %v1509_v39  ;;  %v370_v58 = vsub.f32 1.0, %v274_v17  ;;  %v1611_v39 = vmul.f32 1.25, %v1534_v56 }
  0x62   :  { %2474 = vst [vmem:[#allocation22_spill] sm:$0xff] %v1566_v28 }
  0x63   :  { %1232 = vset.pattern.permute.xlu2 %v1288_v10  ;;  %v557_v10 = vmul.f32 %v553_v18, %v377_v16  ;;  %v26_v18 = vld [vmem:[%s2388_s2 + $0x10] sm:$0xff]  ;;  %v210_v16 = vsub.f32 %v1117_v52, %v1121_v53  ;;  %v214_v52 = vsub.f32 %v1121_v53, %v1125_v63  ;;  %2493 = vst [vmem:[#allocation39_spill] sm:$0xff] %v1704_v51 }
  0x64   :  { %1231 = vset.pattern.permute.xlu1 %v2391_v4  ;;  %970 = vperm.xlu2 %1232, %v1330_v2   ;;  %v1600_v53 = vld [vmem:[%s2386_s0 + $0x10] sm:$0xff]  ;;  %v502_v4 = vmul.f32 1.25, %v1515_v42  ;;  %v1662_v42 = vpop.permute.xlu2 %770 }
  0x65   :  { %1050 = vperm.xlu1 %1231, %v27_v33   ;;  %v1547_v3 = vadd.f32 %v557_v10, %v549_v49  ;;  %v1571_v33 = vsel %vm118_vm14, 1.0, %v2392_v14  ;;  %v1576_v49 = vadd.f32 %v573_v6, %v565_v5  ;;  %v1579_v10 = vmul.f32 0.8333333, %v1417_v27  ;;  %2479 = vst [vmem:[#allocation27_spill] sm:$0xff] %v1600_v53 }
  0x66   :  { %2475 = vst [vmem:[#allocation23_spill] sm:$0xff] %v1571_v33  ;;  %v1589_v60 = vsub.f32 %v1125_v63, %v1571_v33  ;;  %v386_v5 = vsub.f32 1.0, %v1566_v28  ;;  %v756_v27 = vmul.f32 %v1552_v7, %v1560_v29  ;;  %v764_v6 = vmul.f32 %v760_v8, %v1568_v35 }
  0x67   :  { %2477 = vst [vmem:[#allocation25_spill] sm:$0xff] %v1576_v49  ;;  %v1586_v59 = vmul.f32 %v1579_v10, %v1547_v3  ;;  %v1606_v63 = vmul.f32 1.25, %v1544_v0  ;;  %vm59_vm15 = vcmp.ge.f32.partialorder %v1600_v53, -2.2  ;;  %v366_v8 = vmul.f32 %v266_v1, %v210_v16  ;;  %v24_v1 = vld [vmem:[%s2388_s2] sm:$0xff] }
  0x68   :  { %2478 = vst [vmem:[#allocation26_spill] sm:$0xff] %v1589_v60  ;;  %v374_v14 = vmul.f32 %v370_v58, %v214_v52  ;;  %vm71_vm0 = vcmp.ge.f32.partialorder %v1600_v53, -1.8  ;;  %vm83_vm1 = vcmp.ge.f32.partialorder %v1600_v53, -1.4  ;;  %v1622_v62 = vadd.f32 %v764_v6, %v756_v27 }
  0x69   :  { %2480 = vst [vmem:[#allocation28_spill] sm:$0xff] %v1606_v63  ;;  %v1620_v20 = vadd.f32 1.8, %v1600_v53  ;;  %v2483_v58 = vmov 0.0   ;;  %v1631_v26 = vadd.f32 2.2, %v1600_v53 }
  0x6a   :  { %2481 = vst [vmem:[#allocation29_spill] sm:$0xff] %v1622_v62  ;;  %v1110_v48 = vsel %vm59_vm15, 1.0, %v2483_v58  ;;  %vm95_vm2 = vcmp.ge.f32.partialorder %v1600_v53, -1.0  ;;  %vm107_vm3 = vcmp.ge.f32.partialorder %v1600_v53, -0.6  ;;  %v378_v27 = vadd.f32 %v374_v14, %v366_v8 }
  0x6b   :  { %v554_v6 = vsub.f32 1.0, %v502_v4  ;;  %v259_v56 = vmul.f32 2.5, %v1620_v20  ;;  %v1653_v14 = vsel %vm107_vm3, 1.0, %v2483_v58  ;;  %2488 = vst [vmem:[#allocation34_spill] sm:$0xff] %v1662_v42  ;;  %v1698_v42 = vsel %vm144_vm6, 1.0, %v2483_v58 }
  0x6c   :  { %1234 = vset.pattern.permute.xlu2 %v1290_v12  ;;  %v350_v12 = vmul.f32 %v1574_v38, %v1563_v54  ;;  %2487 = vst [vmem:[#allocation33_spill] sm:$0xff] %v1653_v14  ;;  %v1666_v31 = vmul.f32 %v502_v4, %v378_v27  ;;  %v1682_v4 = vadd.f32 2.2, %v1375_v13 }
  0x6d   :  { %1045 = vperm.xlu1 %1231, %v26_v18   ;;  %1010 = vperm.xlu2 %1234, %v1330_v2   ;;  %v358_v2 = vmul.f32 %v354_v41, %v210_v16  ;;  %v1603_v18 = vmul.f32 %v757_v57, %v1576_v49  ;;  %v25_v41 = vld [vmem:[%s2388_s2 + $0x8] sm:$0xff]  ;;  %v382_v57 = vmul.f32 %v274_v17, %v214_v52  ;;  %v1114_v17 = vsel %vm71_vm0, 1.0, %v2483_v58 }
  0x6e   :  { %v390_v49 = vmul.f32 %v386_v5, %v1589_v60  ;;  %v1637_v52 = vadd.f32 1.4, %v1600_v53  ;;  %v2485_v5 = vmov 0   ;;  %v203_v8 = vsub.f32 %v1110_v48, %v1114_v17  ;;  %2492 = vst [vmem:[#allocation38_spill] sm:$0xff] %v1698_v42 }
  0x6f   :  { %v1627_v16 = vadd.f32 %v358_v2, %v350_v12  ;;  %v1118_v12 = vsel %vm83_vm1, 1.0, %v2483_v58  ;;  %v1642_v2 = vadd.f32 1.0, %v1600_v53  ;;  %v1664_v45 = vmul.f32 %v554_v6, %v378_v27 }
  0x70   :  { %2484 = vst [vmem:[#allocation31_spill] sm:$0xff] %v1637_v52  ;;  %v1644_v37 = vadd.f32 %v390_v49, %v382_v57  ;;  %v207_v49 = vsub.f32 %v1114_v17, %v1118_v12  ;;  %v267_v57 = vmul.f32 2.5, %v1637_v52  ;;  %v1672_v48 = vmul.f32 1.25, %v1620_v20 }
  0x71   :  { %2482 = vst [vmem:[#allocation30_spill] sm:$0xff] %v1627_v16  ;;  %v1669_v28 = vmul.f32 2.5, %v1642_v2  ;;  %v339_v17 = vsub.f32 1.0, %v259_v56  ;;  %v1108_v6 = vsel %vm57_vm4, 1.0, %v2483_v58  ;;  %v1686_v38 = vmul.f32 1.25, %v1637_v52 }
  0x72   :  { %2486 = vst [vmem:[#allocation32_spill] sm:$0xff] %v1642_v2  ;;  %v351_v27 = vmul.f32 %v259_v56, %v207_v49  ;;  %v201_v13 = vsub.f32 %v1108_v6, %v1383_v15  ;;  %v337_v56 = vsub.f32 1.0, %v1456_v46  ;;  %v249_v52 = vmul.f32 2.5, %v1682_v4 }
  0x73   :  { %2489 = vst [vmem:[#allocation35_spill] sm:$0xff] %v1669_v28  ;;  %v1711_v46 = vmul.f32 2.5, %v1704_v51  ;;  %v512_v6 = vmul.f32 1.25, %v1438_v36 }
  0x74   :  { %2490 = vst [vmem:[#allocation36_spill] sm:$0xff] %v1686_v38 }
  0x75   :  { %1040 = vperm.xlu1 %1231, %v25_v41   ;;  %1235 = vset.pattern.permute.xlu2 %v2485_v5  ;;  %v1122_v41 = vsel %vm95_vm2, 1.0, %v2483_v58  ;;  %v251_v5 = vmul.f32 2.5, %v1631_v26  ;;  %2495 = vst [vmem:[#allocation41_spill] sm:$0xff] %v1711_v46 }
  0x76   :  { %1035 = vperm.xlu2 %1235, %v24_v1   ;;  %v1658_v1 = vmul.f32 %v1606_v63, %v1627_v16  ;;  %v211_v60 = vsub.f32 %v1118_v12, %v1122_v41  ;;  %v1675_v33 = vsub.f32 %v1122_v41, %v1653_v14  ;;  %v1678_v16 = vmul.f32 1.25, %v1631_v26 }
  0x77   :  { %v335_v54 = vmul.f32 %v251_v5, %v203_v8  ;;  %v355_v63 = vsub.f32 1.0, %v267_v57  ;;  %v1135_v12 = vsel %vm132_vm5, 1.0, %v2483_v58  ;;  %v371_v41 = vsub.f32 1.0, %v1669_v28  ;;  %v1718_v19 = vpop.permute.xlu1 %741 }
  0x78   :  { %v1693_v8 = vadd.f32 0.20000002, %v1398_v21  ;;  %v343_v5 = vmul.f32 %v339_v17, %v207_v49  ;;  %v224_v2 = vsub.f32 %v1447_v43, %v1135_v12  ;;  %v367_v14 = vmul.f32 %v267_v57, %v211_v60  ;;  %2497 = vst [vmem:[#allocation43_spill] sm:$0xff] %v1718_v19  ;;  %v1723_v57 = vpop.permute.xlu2 %782 }
  0x79   :  { %v359_v24 = vmul.f32 %v355_v63, %v211_v60  ;;  %v555_v49 = vsub.f32 1.0, %v1686_v38  ;;  %v1708_v15 = vsub.f32 %v1135_v12, %v1698_v42  ;;  %v375_v62 = vmul.f32 %v371_v41, %v1675_v33 }
  0x7a   :  { %2491 = vst [vmem:[#allocation37_spill] sm:$0xff] %v1693_v8  ;;  %v292_v28 = vmul.f32 2.5, %v1693_v8  ;;  %v1715_v43 = vmul.f32 1.25, %v1693_v8  ;;  %v347_v53 = vadd.f32 %v343_v5, %v335_v54  ;;  %v341_v60 = vmul.f32 %v337_v56, %v1405_v23 }
  0x7b   :  { %2494 = vst [vmem:[#allocation40_spill] sm:$0xff] %v1708_v15  ;;  %v400_v63 = vmul.f32 %v1450_v44, %v1469_v55  ;;  %v333_v12 = vmul.f32 %v249_v52, %v201_v13  ;;  %v420_v38 = vsub.f32 1.0, %v1711_v46  ;;  %v493_v8 = vmul.f32 1.25, %v1682_v4 }
  0x7c   :  { %v404_v17 = vsub.f32 1.0, %v292_v28  ;;  %2496 = vst [vmem:[#allocation42_spill] sm:$0xff] %v1715_v43  ;;  %v416_v42 = vmul.f32 %v292_v28, %v224_v2  ;;  %v1159_v54 = vadd.f32 2.2, %v1398_v21  ;;  %v340_v41 = vsub.f32 1.0, %v1462_v50 }
  0x7d   :  { %v424_v23 = vmul.f32 %v420_v38, %v1708_v15  ;;  %v588_v5 = vsub.f32 1.0, %v512_v6  ;;  %v604_v44 = vsub.f32 1.0, %v1715_v43  ;;  %v1111_v55 = vsel %vm60_vm7, 1.0, %v2483_v58 }
  0x7e   :  { %v408_v51 = vmul.f32 %v404_v17, %v224_v2  ;;  %v204_v28 = vsub.f32 %v1111_v55, %v1423_v30  ;;  %v252_v52 = vmul.f32 2.5, %v1159_v54  ;;  %v344_v2 = vmul.f32 %v340_v41, %v1459_v47 }
  0x7f   :  { %v345_v56 = vadd.f32 %v341_v60, %v333_v12  ;;  %v537_v17 = vsub.f32 1.0, %v1475_v61  ;;  %v1736_v46 = vadd.f32 %v424_v23, %v416_v42  ;;  %v1739_v50 = vmul.f32 0.8333333, %v1438_v36 }
  0x80   :  { %v412_v13 = vadd.f32 %v408_v51, %v400_v63  ;;  %v336_v15 = vmul.f32 %v252_v52, %v204_v28  ;;  %v496_v19 = vmul.f32 1.25, %v1159_v54  ;;  %v540_v43 = vsub.f32 1.0, %v1497_v25  ;;  %v2500_v52 = vld [vmem:[#allocation17_spill] sm:$0xff] }
  0x81   :  { %v363_v21 = vadd.f32 %v359_v24, %v351_v27  ;;  %v1742_v51 = vadd.f32 %v375_v62, %v367_v14  ;;  %v584_v30 = vmul.f32 %v1485_v9, %v1511_v40  ;;  %v608_v47 = vmul.f32 %v604_v44, %v1736_v46 }
  0x82   :  { %v600_v38 = vmul.f32 %v512_v6, %v412_v13  ;;  %v592_v60 = vmul.f32 %v588_v5, %v412_v13  ;;  %v348_v61 = vadd.f32 %v344_v2, %v336_v15  ;;  %v544_v42 = vmul.f32 %v540_v43, %v1503_v34  ;;  %v747_v15 = vpop.permute.xlu1 %746  ;;  %v1759_v34 = vpop.permute.xlu2 %774 }
  0x83   :  { %v720_v36 = vsub.f32 1.0, %v1552_v7  ;;  %v2498_v6 = vsub.f32 1.0, %v1611_v39  ;;  %v1753_v25 = vmul.f32 0.8333333, %v1620_v20  ;;  %v533_v62 = vmul.f32 %v493_v8, %v345_v56 }
  0x84   :  { %v541_v24 = vmul.f32 %v537_v17, %v1487_v11  ;;  %v1756_v14 = vadd.f32 %v608_v47, %v600_v38  ;;  %v840_v9 = vsub.f32 1.0, %v1739_v50  ;;  %v536_v40 = vmul.f32 %v496_v19, %v348_v61  ;;  %v2502_v47 = vld [vmem:[#allocation27_spill] sm:$0xff] }
  0x85   :  { %v574_v63 = vmul.f32 %v2498_v6, %v1644_v37  ;;  %v680_v27 = vmul.f32 0.8333333, %v1159_v54  ;;  %v535_v7 = vmul.f32 %v1678_v16, %v347_v53  ;;  %v2499_v43 = vsub.f32 1.0, %v1672_v48 }
  0x86   :  { %v551_v20 = vmul.f32 %v1672_v48, %v363_v21  ;;  %v559_v8 = vmul.f32 %v555_v49, %v1742_v51  ;;  %v596_v41 = vadd.f32 %v592_v60, %v584_v30  ;;  %v692_v11 = vmul.f32 0.8333333, %v1430_v32 }
  0x87   :  { %v543_v12 = vmul.f32 %v2499_v43, %v363_v21  ;;  %v548_v23 = vadd.f32 %v544_v42, %v536_v40  ;;  %v724_v5 = vmul.f32 %v720_v36, %v1560_v29  ;;  %v1769_v19 = vmul.f32 0.8333333, %v1544_v0  ;;  %v732_v40 = vpop.permute.xlu0 %731  ;;  %v2505_v43 = vld [vmem:[#allocation35_spill] sm:$0xff] }
  0x88   :  { %v545_v54 = vadd.f32 %v541_v24, %v533_v62  ;;  %v677_v44 = vmul.f32 0.8333333, %v1682_v4  ;;  %v717_v53 = vsub.f32 1.0, %v1579_v10  ;;  %v1775_v16 = vadd.f32 %v1664_v45, %v1658_v1  ;;  %v2503_v62 = vld [vmem:[#allocation33_spill] sm:$0xff] }
  0x89   :  { %v836_v21 = vmul.f32 %v692_v11, %v596_v41  ;;  %v844_v48 = vmul.f32 %v840_v9, %v1756_v14  ;;  %v716_v49 = vmul.f32 %v680_v27, %v548_v23  ;;  %v765_v32 = vadd.f32 %v1603_v18, %v1586_v59  ;;  %v2501_v18 = vld [vmem:[#allocation29_spill] sm:$0xff] }
  0x8a   :  { %v1781_v29 = vadd.f32 %v574_v63, %v1666_v31  ;;  %v758_v0 = vsub.f32 1.0, %v1648_v22  ;;  %v679_v4 = vmul.f32 0.8333333, %v1631_v26  ;;  %v547_v55 = vadd.f32 %v543_v12, %v535_v7  ;;  %v823_v42 = vpop.permute.xlu1 %822  ;;  %v863_v6 = vpop.permute.xlu2 %862 }
  0x8b   :  { %v1785_v10 = vadd.f32 %v559_v8, %v551_v20  ;;  %v719_v45 = vsub.f32 1.0, %v1753_v25  ;;  %v728_v1 = vadd.f32 %v724_v5, %v716_v49  ;;  %v713_v13 = vmul.f32 %v677_v44, %v545_v54  ;;  %v2506_v8 = vld [vmem:[#allocation32_spill] sm:$0xff] }
  0x8c   :  { %v721_v28 = vmul.f32 %v717_v53, %v1547_v3  ;;  %v796_v2 = vmul.f32 %v2500_v52, %v1568_v35  ;;  %v800_v59 = vsub.f32 1.0, %v692_v11  ;;  %v788_v31 = vmul.f32 %v1723_v57, %v2501_v18  ;;  %v2507_v11 = vld [vmem:[#allocation34_spill] sm:$0xff] }
  0x8d   :  { %v754_v56 = vmul.f32 %v1769_v19, %v1775_v16  ;;  %v848_v26 = vadd.f32 %v844_v48, %v836_v21  ;;  %v752_v17 = vmul.f32 %v747_v15, %v728_v1  ;;  %v762_v38 = vmul.f32 %v758_v0, %v1781_v29  ;;  %v2504_v15 = vld [vmem:[#allocation14_spill] sm:$0xff] }
  0x8e   :  { %v804_v30 = vmul.f32 %v800_v59, %v596_v41  ;;  %vm119_vm8 = vcmp.ge.f32.partialorder %v2502_v47, -0.20000002  ;;  %v1798_v60 = vadd.f32 0.6, %v2502_v47  ;;  %v715_v3 = vmul.f32 %v679_v4, %v547_v55  ;;  %v2509_v55 = vld [vmem:[#allocation18_spill] sm:$0xff]  ;;  %v2512_v59 = vld [vmem:[#allocation43_spill] sm:$0xff] }
  0x8f   :  { %v723_v35 = vmul.f32 %v719_v45, %v1785_v10  ;;  %v792_v61 = vadd.f32 %v788_v31, %v752_v17  ;;  %v1130_v57 = vsel %vm119_vm8, 1.0, %v2483_v58  ;;  %v725_v36 = vadd.f32 %v721_v28, %v713_v13  ;;  %v2510_v13 = vld [vmem:[#allocation24_spill] sm:$0xff] }
  0x90   :  { %v808_v63 = vadd.f32 %v804_v30, %v796_v2  ;;  %v219_v24 = vsub.f32 %v2503_v62, %v1130_v57  ;;  %v283_v9 = vmul.f32 2.5, %v1798_v60  ;;  %v868_v27 = vmul.f32 %v863_v6, %v848_v26  ;;  %v2517_v6 = vld [vmem:[#allocation21_spill] sm:$0xff] }
  0x91   :  { %vm58_vm9 = vcmp.ge.f32.partialorder %v2504_v15, -2.2  ;;  %v383_v12 = vmul.f32 %v2505_v43, %v1675_v33  ;;  %v1808_v41 = vmul.f32 1.25, %v2506_v8  ;;  %v785_v23 = vmul.f32 %v2507_v11, %v765_v32  ;;  %v2511_v32 = vld [vmem:[#allocation8_spill] sm:$0xff]  ;;  %v1857_v43 = vpop.permute.xlu0 %736 }
  0x92   :  { %v828_v7 = vmul.f32 %v823_v42, %v808_v63  ;;  %v387_v20 = vsub.f32 1.0, %v283_v9  ;;  %v766_v5 = vadd.f32 %v762_v38, %v754_v56  ;;  %v727_v54 = vadd.f32 %v723_v35, %v715_v3  ;;  %v2513_v56 = vld [vmem:[#allocation31_spill] sm:$0xff]  ;;  %v2514_v38 = vld [vmem:[#allocation28_spill] sm:$0xff] }
  0x93   :  { %v1157_v44 = vadd.f32 2.2, %v2504_v15  ;;  %v749_v53 = vmul.f32 %v732_v40, %v725_v36  ;;  %v1109_v21 = vsel %vm58_vm9, 1.0, %v2483_v58  ;;  %v571_v33 = vsub.f32 1.0, %v1808_v41 }
  0x94   :  { %v832_v48 = vadd.f32 %v828_v7, %v792_v61  ;;  %v391_v49 = vmul.f32 %v387_v20, %v219_v24  ;;  %v202_v45 = vsub.f32 %v1109_v21, %v2509_v55  ;;  %v338_v28 = vsub.f32 1.0, %v2510_v13  ;;  %v2519_v55 = vld [vmem:[#allocation30_spill] sm:$0xff] }
  0x95   :  { %v250_v1 = vmul.f32 2.5, %v1157_v44  ;;  %v1819_v52 = vadd.f32 -0.6, %v2511_v32  ;;  %v1822_v2 = vmul.f32 %v1759_v34, %v766_v5  ;;  %v1825_v18 = vmul.f32 %v2512_v59, %v727_v54  ;;  %v2516_v34 = vld [vmem:[#allocation36_spill] sm:$0xff] }
  0x96   :  { %v1813_v0 = vadd.f32 %v868_v27, %v832_v48  ;;  %v395_v4 = vadd.f32 %v391_v49, %v383_v12  ;;  %v1827_v31 = vadd.f32 %v785_v23, %v749_v53  ;;  %v1830_v26 = vmul.f32 0.8333333, %v2513_v56  ;;  %v2518_v48 = vld [vmem:[#allocation38_spill] sm:$0xff] }
  0x97   :  { %v494_v17 = vmul.f32 1.25, %v1157_v44  ;;  %v538_v30 = vsub.f32 1.0, %v2514_v38  ;;  %vm156_vm10 = vcmp.ge.f32.partialorder %v2511_v32, 1.0  ;;  %v1835_v3 = vadd.f32 0.20000002, %v2504_v15  ;;  %v2520_v32 = vld [vmem:[#allocation23_spill] sm:$0xff] }
  0x98   :  { %2508 = vst [vmem:[#allocation17_spill] sm:$0xff] %v1813_v0  ;;  %v1837_v35 = vmul.f32 0.8333333, %v1157_v44  ;;  %v567_v61 = vmul.f32 %v2516_v34, %v1742_v51  ;;  %v575_v42 = vmul.f32 %v571_v33, %v395_v4  ;;  %vm130_vm11 = vcmp.ge.f32.partialorder %v2504_v15, 0.20000003 }
  0x99   :  { %2515 = vst [vmem:[#allocation29_spill] sm:$0xff] %v1835_v3  ;;  %v334_v36 = vmul.f32 %v250_v1, %v202_v45  ;;  %v342_v63 = vmul.f32 %v338_v28, %v2517_v6  ;;  %v1844_v62 = vmul.f32 2.5, %v1819_v52  ;;  %vm131_vm12 = vcmp.ge.f32.partialorder %v2502_v47, 0.20000003 }
  0x9a   :  { %v1848_v40 = vsel %vm156_vm10, 1.0, %v2483_v58  ;;  %v759_v27 = vsub.f32 1.0, %v1830_v26  ;;  %v1852_v7 = vsel %vm131_vm12, 1.0, %v2483_v58  ;;  %v1855_v51 = vadd.f32 0.20000002, %v2502_v47 }
  0x9b   :  { %v1133_v12 = vsel %vm130_vm11, 1.0, %v2483_v58  ;;  %vm142_vm13 = vcmp.ge.f32.partialorder %v2504_v15, 0.6  ;;  %v290_v20 = vmul.f32 2.5, %v1835_v3  ;;  %v1863_v11 = vadd.f32 -0.20000003, %v2504_v15 }
  0x9c   :  { %v579_v23 = vadd.f32 %v575_v42, %v567_v61  ;;  %v1866_v5 = vsub.f32 %v1130_v57, %v1852_v7  ;;  %v1869_v54 = vmul.f32 2.5, %v1855_v51  ;;  %v1872_v44 = vmul.f32 1.25, %v1798_v60 }
  0x9d   :  { %v346_v53 = vadd.f32 %v342_v63, %v334_v36  ;;  %v718_v21 = vsub.f32 1.0, %v1769_v19  ;;  %v1877_v49 = vsub.f32 %v2518_v48, %v1848_v40  ;;  %v436_v33 = vsub.f32 1.0, %v1844_v62  ;;  %v2523_v36 = vld [vmem:[#allocation39_spill] sm:$0xff] }
  0x9e   :  { %v542_v45 = vmul.f32 %v538_v30, %v2519_v55  ;;  %v755_v57 = vmul.f32 %v1753_v25, %v1785_v10  ;;  %v399_v1 = vmul.f32 %v283_v9, %v219_v24  ;;  %v403_v13 = vsub.f32 1.0, %v1869_v54  ;;  %v2521_v10 = vld [vmem:[#allocation40_spill] sm:$0xff]  ;;  %v2522_v24 = vld [vmem:[#allocation41_spill] sm:$0xff] }
  0x9f   :  { %v1885_v28 = vsel %vm142_vm13, 1.0, %v2483_v58  ;;  %v222_v59 = vsub.f32 %v2520_v32, %v1133_v12  ;;  %v1889_v19 = vmul.f32 2.5, %v1863_v11  ;;  %v402_v56 = vsub.f32 1.0, %v290_v20 }
  0xa0   :  { %v763_v38 = vmul.f32 %v759_v27, %v579_v23  ;;  %v407_v34 = vmul.f32 %v403_v13, %v1866_v5  ;;  %v587_v30 = vsub.f32 1.0, %v1872_v44  ;;  %v1894_v61 = vmul.f32 0.8333333, %v2506_v8  ;;  %v2525_v27 = vld [vmem:[#allocation42_spill] sm:$0xff] }
  0xa1   :  { %v534_v25 = vmul.f32 %v494_v17, %v346_v53  ;;  %v432_v9 = vmul.f32 %v2522_v24, %v2521_v10  ;;  %v440_v42 = vmul.f32 %v436_v33, %v1877_v49  ;;  %v1900_v6 = vmul.f32 1.25, %v2523_v36  ;;  %v2526_v17 = vld [vmem:[#allocation26_spill] sm:$0xff]  ;;  %v2528_v10 = vld [vmem:[#allocation20_spill] sm:$0xff] }
  0xa2   :  { %v722_v63 = vmul.f32 %v718_v21, %v1775_v16  ;;  %v616_v48 = vmul.f32 %v2525_v27, %v1736_v46  ;;  %v1905_v55 = vadd.f32 %v407_v34, %v399_v1  ;;  %v583_v13 = vmul.f32 %v1808_v41, %v395_v4  ;;  %v2527_v53 = vld [vmem:[#allocation22_spill] sm:$0xff]  ;;  %v779_v4 = vpop.permute.xlu0 %778 }
  0xa3   :  { %2524 = vst [vmem:[#allocation27_spill] sm:$0xff] %v1900_v6  ;;  %v1909_v8 = vsub.f32 %v1133_v12, %v1885_v28  ;;  %v398_v32 = vmul.f32 %v2527_v53, %v2526_v17  ;;  %v418_v33 = vsub.f32 1.0, %v1889_v19  ;;  %v510_v24 = vmul.f32 1.25, %v2528_v10  ;;  %v2530_v17 = vld [vmem:[#allocation6_spill] sm:$0xff] }
  0xa4   :  { %v767_v0 = vadd.f32 %v763_v38, %v755_v57  ;;  %v406_v36 = vmul.f32 %v402_v56, %v222_v59  ;;  %v591_v16 = vmul.f32 %v587_v30, %v1905_v55  ;;  %v799_v46 = vsub.f32 1.0, %v1894_v61 }
  0xa5   :  { %v546_v21 = vadd.f32 %v542_v45, %v534_v25  ;;  %v1917_v1 = vadd.f32 %v440_v42, %v432_v9  ;;  %v620_v41 = vsub.f32 1.0, %v1900_v6  ;;  %v1921_v12 = vmul.f32 1.25, %v1835_v3 }
  0xa6   :  { %v1923_v34 = vadd.f32 %v591_v16, %v583_v13  ;;  %v795_v27 = vmul.f32 %v1830_v26, %v579_v23  ;;  %v1927_v57 = vadd.f32 0.20000002, %v2530_v17  ;;  %v1930_v56 = vadd.f32 -0.20000003, %v2530_v17  ;;  %v2533_v13 = vld [vmem:[#allocation37_spill] sm:$0xff] }
  0xa7   :  { %2529 = vst [vmem:[#allocation33_spill] sm:$0xff] %v1917_v1  ;;  %v414_v38 = vmul.f32 %v290_v20, %v222_v59  ;;  %v422_v45 = vmul.f32 %v418_v33, %v1909_v8  ;;  %v586_v30 = vsub.f32 1.0, %v510_v24  ;;  %vm129_vm14 = vcmp.ge.f32.partialorder %v2530_v17, 0.20000003  ;;  %v819_v59 = vpop.permute.xlu1 %818 }
  0xa8   :  { %2531 = vst [vmem:[#allocation14_spill] sm:$0xff] %v1927_v57  ;;  %v787_v25 = vmul.f32 %v779_v4, %v767_v0  ;;  %v410_v9 = vadd.f32 %v406_v36, %v398_v32  ;;  %v803_v42 = vmul.f32 %v799_v46, %v1923_v34  ;;  %vm141_vm15 = vcmp.ge.f32.partialorder %v2530_v17, 0.6 }
  0xa9   :  { %2532 = vst [vmem:[#allocation35_spill] sm:$0xff] %v1930_v56  ;;  %v714_v26 = vmul.f32 %v1837_v35, %v546_v21  ;;  %v624_v23 = vmul.f32 %v620_v41, %v1917_v1  ;;  %v1939_v53 = vmul.f32 0.8333333, %v2533_v13  ;;  %v582_v20 = vmul.f32 %v1611_v39, %v1644_v37  ;;  %v2536_v35 = vld [vmem:[#allocation19_spill] sm:$0xff]  ;;  %v2538_v13 = vld [vmem:[#allocation9_spill] sm:$0xff] }
  0xaa   :  { %v807_v33 = vadd.f32 %v803_v42, %v795_v27  ;;  %v1132_v16 = vsel %vm129_vm14, 1.0, %v2483_v58  ;;  %v289_v0 = vmul.f32 2.5, %v1927_v57  ;;  %v1946_v36 = vmul.f32 2.5, %v1930_v56 }
  0xab   :  { %2534 = vst [vmem:[#allocation32_spill] sm:$0xff] %v1939_v53  ;;  %v602_v32 = vsub.f32 1.0, %v1921_v12  ;;  %v690_v46 = vmul.f32 0.8333333, %v2536_v35  ;;  %v1951_v21 = vsel %vm141_vm15, 1.0, %v2483_v58  ;;  %v791_v37 = vadd.f32 %v787_v25, %v1825_v18 }
  0xac   :  { %2535 = vst [vmem:[#allocation34_spill] sm:$0xff] %v1946_v36  ;;  %v1954_v41 = vadd.f32 -0.20000003, %v2502_v47  ;;  %v1957_v39 = vadd.f32 %v422_v45, %v414_v38  ;;  %v590_v4 = vmul.f32 %v586_v30, %v410_v9  ;;  %v827_v27 = vmul.f32 %v819_v59, %v807_v33  ;;  %v2541_v33 = vld [vmem:[#allocation12_spill] sm:$0xff] }
  0xad   :  { %2537 = vst [vmem:[#allocation18_spill] sm:$0xff] %v1951_v21  ;;  %v726_v17 = vadd.f32 %v722_v63, %v714_v26  ;;  %v880_v42 = vsub.f32 1.0, %v1939_v53  ;;  %v221_v56 = vsub.f32 %v2538_v13, %v1132_v16  ;;  %vm143_vm0 = vcmp.ge.f32.partialorder %v2502_v47, 0.6  ;;  %v2543_v13 = vld [vmem:[#allocation10_spill] sm:$0xff] }
  0xae   :  { %v1962_v35 = vadd.f32 %v827_v27, %v791_v37  ;;  %v1965_v6 = vsub.f32 %v1132_v16, %v1951_v21  ;;  %v401_v1 = vsub.f32 1.0, %v289_v0  ;;  %v417_v3 = vsub.f32 1.0, %v1946_v36  ;;  %v2542_v16 = vld [vmem:[#allocation11_spill] sm:$0xff]  ;;  %v815_v21 = vpop.permute.xlu0 %814 }
  0xaf   :  { %v1968_v18 = vadd.f32 %v624_v23, %v616_v48  ;;  %v598_v38 = vmul.f32 %v510_v24, %v410_v9  ;;  %v1971_v45 = vmul.f32 0.8333333, %v2528_v10  ;;  %v299_v63 = vmul.f32 2.5, %v1954_v41 }
  0xb0   :  { %2539 = vst [vmem:[#allocation24_spill] sm:$0xff] %v1965_v6  ;;  %v594_v30 = vadd.f32 %v590_v4, %v582_v20  ;;  %v606_v25 = vmul.f32 %v602_v32, %v1957_v39  ;;  %v798_v26 = vsub.f32 1.0, %v690_v46  ;;  %v1138_v59 = vsel %vm143_vm0, 1.0, %v2483_v58 }
  0xb1   :  { %2540 = vst [vmem:[#allocation8_spill] sm:$0xff] %v1971_v45  ;;  %v397_v37 = vmul.f32 %v2542_v16, %v2541_v33  ;;  %v413_v27 = vmul.f32 %v289_v0, %v221_v56  ;;  %v509_v36 = vmul.f32 1.25, %v2543_v13  ;;  %v1980_v48 = vadd.f32 -0.6, %v2502_v47 }
  0xb2   :  { %v405_v24 = vmul.f32 %v401_v1, %v221_v56  ;;  %v421_v10 = vmul.f32 %v417_v3, %v1965_v6  ;;  %v1984_v9 = vmul.f32 1.25, %v1927_v57  ;;  %vm155_vm1 = vcmp.ge.f32.partialorder %v2502_v47, 1.0  ;;  %v903_v57 = vpop.permute.xlu2 %902 }
  0xb3   :  { %2544 = vst [vmem:[#allocation43_spill] sm:$0xff] %v1980_v48  ;;  %v750_v23 = vmul.f32 %v1857_v43, %v726_v17  ;;  %v876_v20 = vmul.f32 %v1739_v50, %v1756_v14  ;;  %v227_v0 = vsub.f32 %v1852_v7, %v1138_v59  ;;  %v419_v32 = vsub.f32 1.0, %v299_v63 }
  0xb4   :  { %2545 = vst [vmem:[#allocation31_spill] sm:$0xff] %v1984_v9  ;;  %v884_v4 = vmul.f32 %v880_v42, %v1968_v18  ;;  %v838_v33 = vsub.f32 1.0, %v1971_v45  ;;  %v794_v3 = vmul.f32 %v1648_v22, %v1781_v29  ;;  %v307_v1 = vmul.f32 2.5, %v1980_v48 }
  0xb5   :  { %v1996_v56 = vadd.f32 %v606_v25, %v598_v38  ;;  %v802_v16 = vmul.f32 %v798_v26, %v594_v30  ;;  %v1142_v43 = vsel %vm155_vm1, 1.0, %v2483_v58  ;;  %v2000_v17 = vadd.f32 -1.0, %v2502_v47 }
  0xb6   :  { %v409_v50 = vadd.f32 %v405_v24, %v397_v37  ;;  %v2002_v14 = vadd.f32 %v421_v10, %v413_v27  ;;  %v585_v7 = vsub.f32 1.0, %v509_v36  ;;  %v601_v42 = vsub.f32 1.0, %v1984_v9 }
  0xb7   :  { %v415_v22 = vmul.f32 %v1869_v54, %v1866_v5  ;;  %v423_v29 = vmul.f32 %v419_v32, %v227_v0  ;;  %v515_v38 = vmul.f32 1.25, %v1855_v51  ;;  %vm167_vm2 = vcmp.ge.f32.partialorder %v2502_v47, 1.4  ;;  %v2547_v5 = vld [vmem:[#allocation16_spill] sm:$0xff]  ;;  %v2548_v54 = vld [vmem:[#allocation13_spill] sm:$0xff] }
  0xb8   :  { %2546 = vst [vmem:[#allocation28_spill] sm:$0xff] %v2002_v14  ;;  %v2010_v25 = vadd.f32 %v1822_v2, %v750_v23  ;;  %v888_v26 = vadd.f32 %v884_v4, %v876_v20  ;;  %v231_v6 = vsub.f32 %v1138_v59, %v1142_v43  ;;  %v435_v37 = vsub.f32 1.0, %v307_v1  ;;  %v2025_v20 = vpop.permute.xlu1 %858 }
  0xb9   :  { %v834_v27 = vmul.f32 %v690_v46, %v594_v30  ;;  %v842_v24 = vmul.f32 %v838_v33, %v1996_v56  ;;  %v806_v10 = vadd.f32 %v802_v16, %v794_v3  ;;  %v2014_v9 = vmul.f32 2.5, %v2000_v17 }
  0xba   :  { %v581_v32 = vmul.f32 %v2548_v54, %v2547_v5  ;;  %v589_v45 = vmul.f32 %v585_v7, %v409_v50  ;;  %v2019_v53 = vmul.f32 0.8333333, %v2543_v13  ;;  %v2022_v2 = vsel %vm167_vm2, 1.0, %v2483_v58 }
  0xbb   :  { %v597_v59 = vmul.f32 %v509_v36, %v409_v50  ;;  %v605_v46 = vmul.f32 %v601_v42, %v2002_v14  ;;  %v427_v30 = vadd.f32 %v423_v29, %v415_v22  ;;  %v603_v23 = vsub.f32 1.0, %v515_v38 }
  0xbc   :  { %2549 = vst [vmem:[#allocation36_spill] sm:$0xff] %v2019_v53  ;;  %v2027_v4 = vmul.f32 %v903_v57, %v888_v26  ;;  %v431_v33 = vmul.f32 %v299_v63, %v227_v0  ;;  %v439_v3 = vmul.f32 %v435_v37, %v231_v6  ;;  %v519_v16 = vmul.f32 1.25, %v1954_v41 }
  0xbd   :  { %v846_v7 = vadd.f32 %v842_v24, %v834_v27  ;;  %v2030_v5 = vmul.f32 %v815_v21, %v806_v10  ;;  %v2033_v13 = vsub.f32 %v1142_v43, %v2022_v2  ;;  %v451_v36 = vsub.f32 1.0, %v2014_v9  ;;  %v2552_v43 = vld [vmem:[#allocation7_spill] sm:$0xff]  ;;  %v855_v27 = vpop.permute.xlu2 %854 }
  0xbe   :  { %v593_v50 = vadd.f32 %v589_v45, %v581_v32  ;;  %v837_v42 = vsub.f32 1.0, %v2019_v53  ;;  %v695_v22 = vmul.f32 0.8333333, %v1798_v60  ;;  %v2039_v57 = vadd.f32 -0.6, %v2504_v15  ;;  %v2554_v53 = vld [vmem:[#allocation25_spill] sm:$0xff] }
  0xbf   :  { %v2041_v63 = vadd.f32 %v605_v46, %v597_v59  ;;  %v599_v0 = vmul.f32 %v1872_v44, %v1905_v55  ;;  %v607_v21 = vmul.f32 %v603_v23, %v427_v30  ;;  %v2046_v29 = vadd.f32 -1.0, %v2504_v15 }
  0xc0   :  { %v689_v26 = vmul.f32 0.8333333, %v2552_v43  ;;  %v443_v37 = vadd.f32 %v439_v3, %v431_v33  ;;  %v619_v45 = vsub.f32 1.0, %v519_v16  ;;  %vm154_vm3 = vcmp.ge.f32.partialorder %v2504_v15, 1.0 }
  0xc1   :  { %2550 = vst [vmem:[#allocation21_spill] sm:$0xff] %v2041_v63  ;;  %v447_v60 = vmul.f32 %v307_v1, %v231_v6  ;;  %v455_v24 = vmul.f32 %v451_v36, %v2033_v13  ;;  %v2052_v10 = vmul.f32 1.25, %v1980_v48  ;;  %vm166_vm4 = vcmp.ge.f32.partialorder %v2504_v15, 1.4 }
  0xc2   :  { %2551 = vst [vmem:[#allocation38_spill] sm:$0xff] %v2046_v29  ;;  %v2055_v44 = vmul.f32 %v855_v27, %v846_v7  ;;  %v833_v55 = vmul.f32 %v689_v26, %v593_v50  ;;  %v839_v54 = vsub.f32 1.0, %v695_v22  ;;  %v306_v32 = vmul.f32 2.5, %v2039_v57 }
  0xc3   :  { %v841_v59 = vmul.f32 %v837_v42, %v2041_v63  ;;  %v611_v46 = vadd.f32 %v607_v21, %v599_v0  ;;  %v1141_v23 = vsel %vm154_vm3, 1.0, %v2483_v58  ;;  %v2061_v6 = vmul.f32 2.5, %v2046_v29  ;;  %v811_v21 = vpop.permute.xlu1 %810  ;;  %v2555_v63 = vld [vmem:[#allocation15_spill] sm:$0xff] }
  0xc4   :  { %v615_v1 = vmul.f32 %v515_v38, %v427_v30  ;;  %v623_v33 = vmul.f32 %v619_v45, %v443_v37  ;;  %v699_v3 = vmul.f32 0.8333333, %v1855_v51  ;;  %v2065_v15 = vsel %vm166_vm4, 1.0, %v2483_v58  ;;  %v2076_v38 = vld [vmem:[%s2386_s0 + $0x18] sm:$0xff] }
  0xc5   :  { %2553 = vst [vmem:[#allocation30_spill] sm:$0xff] %v2061_v6  ;;  %v835_v7 = vmul.f32 %v1894_v61, %v1923_v34  ;;  %v2069_v36 = vadd.f32 %v455_v24, %v447_v60  ;;  %v635_v42 = vsub.f32 1.0, %v2052_v10  ;;  %v797_v0 = vsub.f32 1.0, %v689_v26 }
  0xc6   :  { %v230_v43 = vsub.f32 %v1885_v28, %v1141_v23  ;;  %v434_v27 = vsub.f32 1.0, %v306_v32  ;;  %vm168_vm5 = vcmp.ge.f32.partialorder %v2076_v38, 1.4  ;;  %v2080_v51 = vadd.f32 -1.0, %v2076_v38 }
  0xc7   :  { %v845_v61 = vadd.f32 %v841_v59, %v833_v55  ;;  %v843_v34 = vmul.f32 %v839_v54, %v611_v46  ;;  %v2083_v30 = vsub.f32 %v1141_v23, %v2065_v15  ;;  %v450_v26 = vsub.f32 1.0, %v2061_v6 }
  0xc8   :  { %v627_v45 = vadd.f32 %v623_v33, %v615_v1  ;;  %v879_v28 = vsub.f32 1.0, %v699_v3  ;;  %v2087_v60 = vmul.f32 0.8333333, %v1954_v41  ;;  %v2090_v24 = vmul.f32 2.5, %v2080_v51 }
  0xc9   :  { %v631_v29 = vmul.f32 %v519_v16, %v443_v37  ;;  %v793_v48 = vmul.f32 %v2555_v63, %v2554_v53  ;;  %v801_v14 = vmul.f32 %v797_v0, %v593_v50  ;;  %v1147_v55 = vsel %vm168_vm5, 1.0, %v2483_v58  ;;  %v851_v37 = vpop.permute.xlu2 %850 }
  0xca   :  { %v639_v54 = vmul.f32 %v635_v42, %v2069_v36  ;;  %v430_v59 = vmul.f32 %v1889_v19, %v1909_v8  ;;  %v438_v23 = vmul.f32 %v434_v27, %v230_v43  ;;  %v518_v1 = vmul.f32 1.25, %v1863_v11 }
  0xcb   :  { %v847_v41 = vadd.f32 %v843_v34, %v835_v7  ;;  %v446_v33 = vmul.f32 %v306_v32, %v230_v43  ;;  %v454_v6 = vmul.f32 %v450_v26, %v2083_v30  ;;  %v2101_v16 = vmul.f32 1.25, %v2039_v57 }
  0xcc   :  { %v875_v53 = vmul.f32 %v695_v22, %v611_v46  ;;  %v883_v50 = vmul.f32 %v879_v28, %v627_v45  ;;  %v236_v63 = vsub.f32 %v1848_v40, %v1147_v55  ;;  %v452_v42 = vsub.f32 1.0, %v2090_v24 }
  0xcd   :  { %v2107_v19 = vadd.f32 %v2030_v5, %v2010_v25  ;;  %v2109_v8 = vmul.f32 %v851_v37, %v845_v61  ;;  %v805_v7 = vadd.f32 %v801_v14, %v793_v48  ;;  %v2112_v32 = vadd.f32 -1.4, %v2076_v38  ;;  %v2121_v25 = vpop.permute.xlu1 %942  ;;  %v899_v61 = vpop.permute.xlu0 %898 }
  0xce   :  { %v2114_v0 = vadd.f32 %v639_v54, %v631_v29  ;;  %v919_v43 = vsub.f32 1.0, %v2087_v60  ;;  %v442_v22 = vadd.f32 %v438_v23, %v430_v59  ;;  %v618_v46 = vsub.f32 1.0, %v518_v1 }
  0xcf   :  { %v867_v40 = vmul.f32 %v2025_v20, %v847_v41  ;;  %v2118_v27 = vadd.f32 %v454_v6, %v446_v33  ;;  %v634_v34 = vsub.f32 1.0, %v2101_v16  ;;  %vm180_vm6 = vcmp.ge.f32.partialorder %v2076_v38, 1.8 }
  0xd0   :  { %v887_v48 = vadd.f32 %v883_v50, %v875_v53  ;;  %v448_v14 = vmul.f32 %v1844_v62, %v1877_v49  ;;  %v456_v5 = vmul.f32 %v452_v42, %v236_v63  ;;  %v524_v29 = vmul.f32 1.25, %v1819_v52 }
  0xd1   :  { %v915_v26 = vmul.f32 %v699_v3, %v627_v45  ;;  %v825_v28 = vmul.f32 %v811_v21, %v805_v7  ;;  %v324_v20 = vmul.f32 2.5, %v2112_v32  ;;  %v1199_v6 = vadd.f32 -1.8, %v2076_v38  ;;  %v2557_v7 = vld [vmem:[#allocation29_spill] sm:$0xff] }
  0xd2   :  { %v923_v54 = vmul.f32 %v919_v43, %v2114_v0  ;;  %v614_v59 = vmul.f32 %v1921_v12, %v1957_v39  ;;  %v622_v23 = vmul.f32 %v618_v46, %v442_v22  ;;  %v1151_v41 = vsel %vm180_vm6, 1.0, %v2483_v58 }
  0xd3   :  { %v630_v33 = vmul.f32 %v518_v1, %v442_v22  ;;  %v638_v62 = vmul.f32 %v634_v34, %v2118_v27  ;;  %v2135_v49 = vmul.f32 0.8333333, %v1863_v11  ;;  %vm192_vm7 = vcmp.ge.f32.partialorder %v2076_v38, 2.2  ;;  %v939_v22 = vpop.permute.xlu2 %938 }
  0xd4   :  { %v871_v3 = vadd.f32 %v867_v40, %v1962_v35  ;;  %v907_v21 = vmul.f32 %v899_v61, %v887_v48  ;;  %v460_v45 = vadd.f32 %v456_v5, %v448_v14  ;;  %v636_v37 = vsub.f32 1.0, %v524_v29  ;;  %v2558_v40 = vld [vmem:[#allocation39_spill] sm:$0xff] }
  0xd5   :  { %2556 = vst [vmem:[#allocation23_spill] sm:$0xff] %v2135_v49  ;;  %v2140_v53 = vadd.f32 %v825_v28, %v1827_v31  ;;  %v240_v12 = vsub.f32 %v1147_v55, %v1151_v41  ;;  %v468_v39 = vsub.f32 1.0, %v324_v20  ;;  %v332_v50 = vmul.f32 2.5, %v1199_v6  ;;  %v2560_v55 = vld [vmem:[#allocation33_spill] sm:$0xff]  ;;  %v2561_v14 = vld [vmem:[#allocation27_spill] sm:$0xff] }
  0xd6   :  { %v927_v42 = vadd.f32 %v923_v54, %v915_v26  ;;  %v626_v1 = vadd.f32 %v622_v23, %v614_v59  ;;  %v698_v43 = vmul.f32 0.8333333, %v2557_v7  ;;  %v1155_v11 = vsel %vm192_vm7, 1.0, %v2483_v58  ;;  %v2156_v59 = vpop.permute.xlu1 %894  ;;  %v2564_v7 = vld [vmem:[#allocation17_spill] sm:$0xff] }
  0xd7   :  { %v2144_v46 = vadd.f32 %v638_v62, %v630_v33  ;;  %v918_v35 = vsub.f32 1.0, %v2135_v49  ;;  %v2148_v34 = vmul.f32 0.8333333, %v2558_v40  ;;  %v528_v31 = vmul.f32 1.25, %v2080_v51 }
  0xd8   :  { %v2151_v48 = vadd.f32 %v907_v21, %v871_v3  ;;  %v632_v5 = vmul.f32 %v2561_v14, %v2560_v55  ;;  %v640_v61 = vmul.f32 %v636_v37, %v460_v45  ;;  %v464_v26 = vmul.f32 %v2090_v24, %v236_v63  ;;  %v2563_v3 = vld [vmem:[#allocation32_spill] sm:$0xff] }
  0xd9   :  { %v472_v28 = vmul.f32 %v468_v39, %v240_v12  ;;  %v244_v6 = vsub.f32 %v1151_v41, %v1155_v11  ;;  %v484_v54 = vsub.f32 1.0, %v332_v50  ;;  %v2159_v23 = vadd.f32 -1.4, %v2502_v47 }
  0xda   :  { %2559 = vst [vmem:[#allocation40_spill] sm:$0xff] %v2151_v48  ;;  %v2161_v33 = vmul.f32 %v939_v22, %v927_v42  ;;  %v914_v62 = vmul.f32 %v698_v43, %v626_v1  ;;  %v916_v21 = vmul.f32 %v2563_v3, %v1968_v18  ;;  %v2167_v40 = vadd.f32 %v2027_v4, %v2564_v7 }
  0xdb   :  { %v922_v24 = vmul.f32 %v918_v35, %v2144_v46  ;;  %v920_v63 = vsub.f32 1.0, %v2148_v34  ;;  %v652_v41 = vsub.f32 1.0, %v528_v31  ;;  %vm179_vm8 = vcmp.ge.f32.partialorder %v2502_v47, 1.8  ;;  %v2180_v35 = vld [vmem:[%s2386_s0] sm:$0xff] }
  0xdc   :  { %2562 = vst [vmem:[#allocation41_spill] sm:$0xff] %v2161_v33  ;;  %v644_v37 = vadd.f32 %v640_v61, %v632_v5  ;;  %v480_v39 = vmul.f32 %v324_v20, %v240_v12  ;;  %v532_v50 = vmul.f32 1.25, %v2112_v32  ;;  %v1198_v42 = vadd.f32 -1.8, %v2502_v47 }
  0xdd   :  { %2565 = vst [vmem:[#allocation42_spill] sm:$0xff] %v2167_v40  ;;  %v476_v11 = vadd.f32 %v472_v28, %v464_v26  ;;  %v488_v22 = vmul.f32 %v484_v54, %v244_v6  ;;  %v878_v18 = vsub.f32 1.0, %v698_v43  ;;  %v323_v55 = vmul.f32 2.5, %v2159_v23  ;;  %v2567_v28 = vld [vmem:[#allocation8_spill] sm:$0xff] }
  0xde   :  { %v1150_v4 = vsel %vm179_vm8, 1.0, %v2483_v58  ;;  %vm191_vm9 = vcmp.ge.f32.partialorder %v2502_v47, 2.2  ;;  %2566 = vst [vmem:[#allocation26_spill] sm:$0xff] %v2180_v35  ;;  %vm153_vm10 = vcmp.ge.f32.partialorder %v2180_v35, 1.0  ;;  %v926_v20 = vadd.f32 %v922_v24, %v914_v62  ;;  %v2571_v40 = vld [vmem:[#allocation24_spill] sm:$0xff] }
  0xdf   :  { %v2184_v32 = vadd.f32 -0.6, %v2180_v35  ;;  %v648_v12 = vmul.f32 %v524_v29, %v460_v45  ;;  %v708_v43 = vmul.f32 0.8333333, %v1819_v52  ;;  %v712_v14 = vmul.f32 0.8333333, %v2080_v51  ;;  %v935_v45 = vpop.permute.xlu2 %934 }
  0xe0   :  { %v668_v5 = vsub.f32 1.0, %v532_v50  ;;  %v331_v61 = vmul.f32 2.5, %v1198_v42  ;;  %v2189_v47 = vsel %vm153_vm10, 1.0, %v2483_v58  ;;  %v874_v6 = vmul.f32 %v2567_v28, %v1996_v56  ;;  %v2569_v42 = vld [vmem:[#allocation18_spill] sm:$0xff]  ;;  %v2205_v56 = vpop.permute.xlu1 %890 }
  0xe1   :  { %v2192_v26 = vmul.f32 2.5, %v2184_v32  ;;  %v1154_v54 = vsel %vm191_vm9, 1.0, %v2483_v58  ;;  %v239_v62 = vsub.f32 %v2022_v2, %v1150_v4  ;;  %v467_v29 = vsub.f32 1.0, %v323_v55  ;;  %2570 = vst [vmem:[#allocation20_spill] sm:$0xff] %v2205_v56  ;;  %v2572_v56 = vld [vmem:[#allocation34_spill] sm:$0xff] }
  0xe2   :  { %v924_v52 = vmul.f32 %v920_v63, %v644_v37  ;;  %v656_v3 = vmul.f32 %v652_v41, %v476_v11  ;;  %v492_v51 = vadd.f32 %v488_v22, %v480_v39  ;;  %v882_v7 = vmul.f32 %v878_v18, %v626_v1 }
  0xe3   :  { %v2198_v24 = vmul.f32 %v935_v45, %v926_v20  ;;  %v960_v50 = vsub.f32 1.0, %v708_v43  ;;  %v2202_v33 = vsub.f32 %v2569_v42, %v2189_v47  ;;  %v433_v48 = vsub.f32 1.0, %v2192_v26 }
  0xe4   :  { %v1000_v28 = vsub.f32 1.0, %v712_v14  ;;  %v2209_v2 = vadd.f32 %v2055_v44, %v2107_v19  ;;  %v243_v63 = vsub.f32 %v1150_v4, %v1154_v54  ;;  %v483_v41 = vsub.f32 1.0, %v331_v61  ;;  %v2573_v44 = vld [vmem:[#allocation35_spill] sm:$0xff] }
  0xe5   :  { %2568 = vst [vmem:[#allocation22_spill] sm:$0xff] %v2198_v24  ;;  %v664_v39 = vmul.f32 %v528_v31, %v476_v11  ;;  %v463_v1 = vmul.f32 %v2014_v9, %v2033_v13  ;;  %v471_v22 = vmul.f32 %v467_v29, %v239_v62  ;;  %v527_v18 = vmul.f32 1.25, %v2000_v17 }
  0xe6   :  { %v928_v20 = vadd.f32 %v924_v52, %v916_v21  ;;  %v660_v45 = vadd.f32 %v656_v3, %v648_v12  ;;  %v672_v42 = vmul.f32 %v668_v5, %v492_v51  ;;  %v886_v24 = vadd.f32 %v882_v7, %v874_v6 }
  0xe7   :  { %v429_v14 = vmul.f32 %v2572_v56, %v2571_v40  ;;  %v437_v49 = vmul.f32 %v433_v48, %v2202_v33  ;;  %v517_v19 = vmul.f32 1.25, %v2573_v44  ;;  %v2219_v4 = vadd.f32 -1.0, %v2180_v35 }
  0xe8   :  { %v956_v31 = vmul.f32 %v2148_v34, %v644_v37  ;;  %v479_v9 = vmul.f32 %v323_v55, %v239_v62  ;;  %v487_v13 = vmul.f32 %v483_v41, %v243_v63  ;;  %v531_v11 = vmul.f32 1.25, %v2159_v23  ;;  %v2244_v3 = vpop.permute.xlu1 %978  ;;  %v2578_v41 = vld [vmem:[#allocation14_spill] sm:$0xff] }
  0xe9   :  { %v475_v21 = vadd.f32 %v471_v22, %v463_v1  ;;  %v651_v12 = vsub.f32 1.0, %v527_v18  ;;  %vm165_vm11 = vcmp.ge.f32.partialorder %v2180_v35, 1.4  ;;  %v2225_v5 = vadd.f32 -1.4, %v2180_v35  ;;  %2574 = vst [vmem:[#allocation6_spill] sm:$0xff] %v2244_v3 }
  0xea   :  { %v2228_v48 = vmul.f32 %v2121_v25, %v928_v20  ;;  %v964_v40 = vmul.f32 %v960_v50, %v660_v45  ;;  %v676_v61 = vadd.f32 %v672_v42, %v664_v39  ;;  %v2231_v6 = vmul.f32 %v2156_v59, %v886_v24  ;;  %v2250_v24 = vpop.permute.xlu2 %1022  ;;  %v2577_v50 = vld [vmem:[#allocation31_spill] sm:$0xff] }
  0xeb   :  { %v441_v34 = vadd.f32 %v437_v49, %v429_v14  ;;  %v617_v37 = vsub.f32 1.0, %v517_v19  ;;  %vm177_vm12 = vcmp.ge.f32.partialorder %v2180_v35, 1.8  ;;  %v313_v23 = vmul.f32 2.5, %v2219_v4  ;;  %2575 = vst [vmem:[#allocation37_spill] sm:$0xff] %v2250_v24  ;;  %v2579_v20 = vld [vmem:[#allocation43_spill] sm:$0xff] }
  0xec   :  { %v491_v55 = vadd.f32 %v487_v13, %v479_v9  ;;  %v667_v54 = vsub.f32 1.0, %v531_v11  ;;  %v2236_v62 = vmul.f32 0.8333333, %v2000_v17  ;;  %v1144_v29 = vsel %vm165_vm11, 1.0, %v2483_v58  ;;  %v2576_v17 = vld [vmem:[#allocation28_spill] sm:$0xff]  ;;  %v2580_v14 = vld [vmem:[#allocation21_spill] sm:$0xff] }
  0xed   :  { %v2239_v25 = vmul.f32 %v708_v43, %v660_v45  ;;  %v647_v52 = vmul.f32 %v2052_v10, %v2069_v36  ;;  %v655_v59 = vmul.f32 %v651_v12, %v475_v21  ;;  %v321_v49 = vmul.f32 2.5, %v2225_v5 }
  0xee   :  { %v2246_v51 = vadd.f32 %v964_v40, %v956_v31  ;;  %v2248_v7 = vmul.f32 %v1000_v28, %v676_v61  ;;  %v613_v56 = vmul.f32 %v2577_v50, %v2576_v17  ;;  %v2255_v43 = vsel %vm177_vm12, 1.0, %v2483_v58  ;;  %v2581_v31 = vld [vmem:[#allocation36_spill] sm:$0xff] }
  0xef   :  { %v621_v63 = vmul.f32 %v617_v37, %v441_v34  ;;  %v697_v10 = vmul.f32 0.8333333, %v2578_v41  ;;  %v233_v36 = vsub.f32 %v2189_v47, %v1144_v29  ;;  %v449_v39 = vsub.f32 1.0, %v313_v23 }
  0xf0   :  { %v663_v1 = vmul.f32 %v527_v18, %v475_v21  ;;  %v671_v22 = vmul.f32 %v667_v54, %v491_v55  ;;  %v2260_v45 = vmul.f32 0.8333333, %v2579_v20  ;;  %v2263_v42 = vadd.f32 %v655_v59, %v647_v52 }
  0xf1   :  { %v2267_v9 = vmul.f32 %v2581_v31, %v2580_v14  ;;  %v237_v13 = vsub.f32 %v1144_v29, %v2255_v43  ;;  %v465_v11 = vsub.f32 1.0, %v321_v49  ;;  %v2272_v47 = vadd.f32 %v2109_v8, %v2140_v53  ;;  %v2287_v8 = vld [vmem:[%s2386_s0 + $0x8] sm:$0xff] }
  0xf2   :  { %v521_v18 = vmul.f32 1.25, %v2184_v32  ;;  %v2276_v21 = vmul.f32 1.25, %v2219_v4  ;;  %v1196_v12 = vadd.f32 -1.8, %v2180_v35  ;;  %v625_v40 = vadd.f32 %v621_v63, %v613_v56 }
  0xf3   :  { %v877_v61 = vsub.f32 1.0, %v697_v10  ;;  %v445_v37 = vmul.f32 %v2192_v26, %v2202_v33  ;;  %v453_v55 = vmul.f32 %v449_v39, %v233_v36  ;;  %v2281_v54 = vadd.f32 %v671_v22, %v663_v1  ;;  %v2584_v22 = vld [vmem:[#allocation38_spill] sm:$0xff] }
  0xf4   :  { %v461_v29 = vmul.f32 %v313_v23, %v233_v36  ;;  %vm189_vm13 = vcmp.ge.f32.partialorder %v2180_v35, 2.2  ;;  %vm178_vm14 = vcmp.ge.f32.partialorder %v2287_v8, 1.8  ;;  %v469_v53 = vmul.f32 %v465_v11, %v237_v13 }
  0xf5   :  { %v629_v52 = vmul.f32 %v517_v19, %v441_v34  ;;  %v2291_v59 = vmul.f32 0.8333333, %v2573_v44  ;;  %v1149_v33 = vsel %vm178_vm14, 1.0, %v2483_v58  ;;  %v633_v26 = vsub.f32 1.0, %v521_v18  ;;  %v2302_v19 = vpop.permute.xlu1 %974  ;;  %v2304_v44 = vpop.permute.xlu2 %1018 }
  0xf6   :  { %v649_v17 = vsub.f32 1.0, %v2276_v21  ;;  %v329_v23 = vmul.f32 2.5, %v1196_v12  ;;  %v1193_v50 = vadd.f32 -1.4, %v2287_v8  ;;  %v2296_v56 = vmul.f32 %v877_v61, %v625_v40  ;;  %2582 = vst [vmem:[#allocation19_spill] sm:$0xff] %v2302_v19 }
  0xf7   :  { %v457_v63 = vadd.f32 %v453_v55, %v445_v37  ;;  %v2299_v41 = vmul.f32 0.8333333, %v2184_v32  ;;  %v1152_v36 = vsel %vm189_vm13, 1.0, %v2483_v58  ;;  %2583 = vst [vmem:[#allocation9_spill] sm:$0xff] %v2304_v44  ;;  %v2306_v34 = vmul.f32 %v697_v10, %v625_v40  ;;  %v2585_v10 = vld [vmem:[#allocation30_spill] sm:$0xff] }
  0xf8   :  { %v238_v39 = vsub.f32 %v2065_v15, %v1149_v33  ;;  %v322_v1 = vmul.f32 2.5, %v1193_v50  ;;  %v526_v20 = vmul.f32 1.25, %v2584_v22  ;;  %v2310_v14 = vadd.f32 %v469_v53, %v461_v29 }
  0xf9   :  { %v917_v31 = vsub.f32 1.0, %v2291_v59  ;;  %v2315_v32 = vmul.f32 %v2087_v60, %v2114_v0  ;;  %v959_v11 = vsub.f32 1.0, %v2260_v45  ;;  %v241_v12 = vsub.f32 %v2255_v43, %v1152_v36 }
  0xfa   :  { %v481_v61 = vsub.f32 1.0, %v329_v23  ;;  %v462_v40 = vmul.f32 %v2585_v10, %v2083_v30  ;;  %v466_v15 = vsub.f32 1.0, %v322_v1  ;;  %v637_v37 = vmul.f32 %v633_v26, %v457_v63 }
  0xfb   :  { %v33_v55 = vsub.f32 0.0, %v2180_v35  ;;  %vm190_vm15 = vcmp.ge.f32.partialorder %v2287_v8, 2.2  ;;  %v1197_v29 = vadd.f32 -1.8, %v2287_v8  ;;  %v477_v53 = vmul.f32 %v321_v49, %v237_v13 }
  0xfc   :  { %v470_v28 = vmul.f32 %v466_v15, %v238_v39  ;;  %v650_v60 = vsub.f32 1.0, %v526_v20  ;;  %v1153_v0 = vsel %vm190_vm15, 1.0, %v2483_v58  ;;  %v530_v23 = vmul.f32 1.25, %v1193_v50 }
  0xfd   :  { %v37_v44 = vmul.f32 1.442695, %v33_v55  ;;  %v242_v24 = vsub.f32 %v1149_v33, %v1153_v0  ;;  %v330_v43 = vmul.f32 2.5, %v1197_v29  ;;  %v485_v36 = vmul.f32 %v481_v61, %v241_v12  ;;  %v28_v33 = vld [vmem:[#allocation2] sm:$0x1]  ;;  %v983_v55 = vpop.permute.xlu0 %982 }
  0xfe   :  { %v529_v30 = vmul.f32 1.25, %v2225_v5  ;;  %v474_v10 = vadd.f32 %v470_v28, %v462_v40  ;;  %v36_v26 = vsub.f32 0.0, %v2076_v38  ;;  %v706_v35 = vmul.f32 0.8333333, %v2039_v57  ;;  %v2330_v5 = vpop.permute.xlu1 %1050  ;;  %v2335_v57 = vld [vmem:[%s2386_s0 + $0x10] sm:$0xff]  ;;  %1063 = vperm.xlu0 %1236, %v28_v33   ;;  %s1293_s0 = smov [#allocation3]  }
  0xff   :  { %1237 = vpow2.f32 %v37_v44  ;;  %v478_v19 = vmul.f32 %v322_v1, %v238_v39  ;;  %v482_v3 = vsub.f32 1.0, %v330_v43  ;;  %v641_v49 = vadd.f32 %v637_v37, %v629_v52  ;;  %v2339_v52 = vpop.permute.xlu2 %970  ;;  %s1097_s20 = sshll.u32 %s1293_s0, 4  ;;  %s1098_s20 = int_to_ptr.vmem [resolvable:$true] %s1097_s20 }
 0x100   :  { %v645_v13 = vmul.f32 %v521_v18, %v457_v63  ;;  %v646_v58 = vmul.f32 %v2101_v16, %v2118_v27  ;;  %v654_v15 = vmul.f32 %v650_v60, %v474_v10  ;;  %v666_v12 = vsub.f32 1.0, %v530_v23 }
 0x101   :  { %v486_v50 = vmul.f32 %v482_v3, %v242_v24  ;;  %v43_v61 = vmul.f32 1.442695, %v36_v26  ;;  %v35_v28 = vsub.f32 0.0, %v2335_v57  ;;  %v653_v18 = vmul.f32 %v649_v17, %v2310_v14 }
 0x102   :  { %v489_v16 = vadd.f32 %v485_v36, %v477_v53  ;;  %v665_v27 = vsub.f32 1.0, %v529_v30  ;;  %v34_v3 = vsub.f32 0.0, %v2287_v8  ;;  %v958_v24 = vsub.f32 1.0, %v706_v35  ;;  %v2586_v30 = vld [vmem:[#allocation23_spill] sm:$0xff] }
 0x103   :  { %v490_v63 = vadd.f32 %v486_v50, %v478_v19  ;;  %1239 = vpow2.f32 %v43_v61  ;;  %v41_v44 = vmul.f32 1.442695, %v35_v28  ;;  %v658_v39 = vadd.f32 %v654_v15, %v646_v58  ;;  %v2588_v15 = vld [vmem:[#allocation20_spill] sm:$0xff] }
 0x104   :  { %v662_v1 = vmul.f32 %v526_v20, %v474_v10  ;;  %v710_v40 = vmul.f32 0.8333333, %v2584_v22  ;;  %v39_v37 = vmul.f32 1.442695, %v34_v3  ;;  %v885_v60 = vadd.f32 %v2296_v56, %v2267_v9 }
 0x105   :  { %v1238_v29 = vpop.eup %1237  ;;  %v963_v17 = vmul.f32 %v959_v11, %v2263_v42  ;;  %v670_v0 = vmul.f32 %v666_v12, %v490_v63  ;;  %1241 = vpow2.f32 %v41_v44  ;;  %v657_v53 = vadd.f32 %v653_v18, %v645_v13 }
 0x106   :  { %v957_v43 = vsub.f32 1.0, %v2299_v41  ;;  %v921_v23 = vmul.f32 %v917_v31, %v641_v49  ;;  %1243 = vpow2.f32 %v39_v37  ;;  %v661_v19 = vmul.f32 %v2276_v21, %v2310_v14  ;;  %v931_v14 = vpop.permute.xlu0 %930 }
 0x107   :  { %v669_v20 = vmul.f32 %v665_v27, %v489_v16  ;;  %v709_v22 = vmul.f32 0.8333333, %v2219_v4  ;;  %v45_v36 = vadd.f32 1.0, %v1238_v29  ;;  %v954_v10 = vmul.f32 %v2586_v30, %v2144_v46 }
 0x108   :  { %v962_v9 = vmul.f32 %v958_v24, %v658_v39  ;;  %v674_v56 = vadd.f32 %v670_v0, %v662_v1  ;;  %v998_v11 = vsub.f32 1.0, %v710_v40  ;;  %v995_v13 = vmul.f32 %v2260_v45, %v2263_v42  ;;  %v1046_v42 = vpop.permute.xlu1 %1045  ;;  %v2589_v24 = vld [vmem:[#allocation42_spill] sm:$0xff] }
 0x109   :  { %v1240_v26 = vpop.eup %1239  ;;  %v2587_v31 = vsub.f32 1.0, %v2236_v62  ;;  %v905_v21 = vmul.f32 %v2588_v15, %v885_v60  ;;  %v967_v4 = vadd.f32 %v963_v17, %v2315_v32  ;;  %v953_v33 = vmul.f32 %v2291_v59, %v641_v49  ;;  %v1011_v62 = vpop.permute.xlu2 %1010  ;;  %v2593_v17 = vld [vmem:[#allocation41_spill] sm:$0xff] }
 0x10a   :  { %v961_v50 = vmul.f32 %v957_v43, %v657_v53  ;;  %v925_v46 = vadd.f32 %v921_v23, %v2306_v34  ;;  %v48_v12 = vadd.f32 1.0, %v1240_v26  ;;  %v673_v28 = vadd.f32 %v669_v20, %v661_v19  ;;  %v2595_v19 = vld [vmem:[#allocation22_spill] sm:$0xff] }
 0x10b   :  { %v1003_v58 = vmul.f32 %v2587_v31, %v2281_v54  ;;  %v1242_v61 = vpop.eup %1241  ;;  %v997_v18 = vsub.f32 1.0, %v709_v22  ;;  %1245 = vrcp.f32 %v45_v36  ;;  %v994_v45 = vmul.f32 %v706_v35, %v658_v39  ;;  %v2590_v39 = vld [vmem:[#allocation6_spill] sm:$0xff]  ;;  %v2596_v22 = vld [vmem:[#allocation9_spill] sm:$0xff] }
 0x10c   :  { %v1244_v16 = vpop.eup %1243  ;;  %v966_v54 = vadd.f32 %v962_v9, %v954_v10  ;;  %v1002_v27 = vmul.f32 %v998_v11, %v674_v56  ;;  %1247 = vrcp.f32 %v48_v12  ;;  %v47_v3 = vadd.f32 1.0, %v1242_v61  ;;  %v2597_v31 = vld [vmem:[#allocation26_spill] sm:$0xff] }
 0x10d   :  { %v952_v32 = vadd.f32 %v2228_v48, %v2589_v24  ;;  %v988_v59 = vmul.f32 %v983_v55, %v2246_v51  ;;  %v1008_v34 = vadd.f32 %v2248_v7, %v2239_v25  ;;  %v46_v49 = vadd.f32 1.0, %v1244_v16  ;;  %v2591_v51 = vld [vmem:[#allocation19_spill] sm:$0xff]  ;;  %v2592_v7 = vld [vmem:[#allocation40_spill] sm:$0xff] }
 0x10e   :  { %v910_v63 = vadd.f32 %v2231_v6, %v2209_v2  ;;  %v1007_v35 = vadd.f32 %v1003_v58, %v995_v13  ;;  %v909_v44 = vadd.f32 %v905_v21, %v2272_v47  ;;  %1249 = vrcp.f32 %v47_v3  ;;  %v2594_v6 = vld [vmem:[#allocation37_spill] sm:$0xff]  ;;  %v1015_v47 = vpop.permute.xlu0 %1014 }
 0x10f   :  { %v987_v1 = vmul.f32 %v2590_v39, %v967_v4  ;;  %v993_v40 = vmul.f32 %v2299_v41, %v657_v53  ;;  %v1001_v37 = vmul.f32 %v997_v18, %v673_v28  ;;  %1251 = vrcp.f32 %v46_v49 }
 0x110   :  { %v965_v48 = vadd.f32 %v961_v50, %v953_v33  ;;  %v945_v29 = vmul.f32 %v931_v14, %v925_v46  ;;  %v986_v55 = vmul.f32 %v2591_v51, %v966_v54  ;;  %v1006_v60 = vadd.f32 %v1002_v27, %v994_v45  ;;  %v1041_v4 = vpop.permute.xlu1 %1040 }
 0x111   :  { %v1246_v25 = vpop.eup %1245  ;;  %v951_v0 = vadd.f32 %v2593_v17, %v2592_v7  ;;  %v992_v2 = vadd.f32 %v988_v59, %v952_v32  ;;  %v1028_v43 = vmul.f32 %v2594_v6, %v1008_v34  ;;  %v950_v20 = vadd.f32 %v2595_v19, %v910_v63  ;;  %v1036_v33 = vpop.permute.xlu2 %1035 }
 0x112   :  { %v1248_v23 = vpop.eup %1247  ;;  %v1027_v41 = vmul.f32 %v2596_v22, %v1007_v35  ;;  %v1005_v36 = vadd.f32 %v1001_v37, %v993_v40  ;;  %v985_v9 = vmul.f32 %v2339_v52, %v965_v48  ;;  %v949_v56 = vadd.f32 %v945_v29, %v909_v44 }
 0x113   :  { %v991_v53 = vadd.f32 %v987_v1, %v951_v0  ;;  %v56_v30 = vmul.f32 %v2076_v38, %v1248_v23  ;;  %v990_v11 = vadd.f32 %v986_v55, %v950_v20  ;;  %v1026_v26 = vmul.f32 %v1015_v47, %v1006_v60 }
 0x114   :  { %v1250_v10 = vpop.eup %1249  ;;  %v53_v58 = vmul.f32 %v2597_v31, %v1246_v25  ;;  %v1032_v21 = vadd.f32 %v1028_v43, %v992_v2  ;;  %v1025_v46 = vmul.f32 %v1011_v62, %v1005_v36  ;;  %v989_v18 = vadd.f32 %v985_v9, %v949_v56 }
 0x115   :  { %v1252_v13 = vpop.eup %1251  ;;  %v1056_v15 = vmul.f32 %v2330_v5, %v56_v30  ;;  %v55_v14 = vmul.f32 %v2335_v57, %v1250_v10  ;;  %v1031_v61 = vadd.f32 %v1027_v41, %v991_v53  ;;  %v1030_v52 = vadd.f32 %v1026_v26, %v990_v11 }
 0x116   :  { %v54_v50 = vmul.f32 %v2287_v8, %v1252_v13  ;;  %v1053_v45 = vmul.f32 %v1036_v33, %v53_v58  ;;  %v1029_v27 = vadd.f32 %v1025_v46, %v989_v18  ;;  %vm1067_vm0 = vcmask 261120  }
 0x117   :  { %v1060_v38 = vadd.f32 %v1056_v15, %v1032_v21  ;;  %v1055_v12 = vmul.f32 %v1046_v42, %v55_v14  ;;  %v1292_v57 = vmov 1.0  }
 0x118   :  { %v1054_v28 = vmul.f32 %v1041_v4, %v54_v50  ;;  %v1057_v5 = vadd.f32 %v1053_v45, %v1029_v27 }
 0x119   :  { %1083 = vmatpush.msra.mxu0 %v1060_v38  ;;  %v1059_v16 = vadd.f32 %v1055_v12, %v1031_v61 }
 0x11a   :  { %v1058_v54 = vadd.f32 %v1054_v28, %v1030_v52 }
 0x11b   :  { %1084 = vmatpush.msra.mxu0 %v1059_v16 }
 0x11d   :  { %1085 = vmatpush.msra.mxu0 %v1058_v54 }
 0x11f   :  { %1086 = vmatpush.msra.mxu0 %v1057_v5 }
 0x120   :  { %1200 = vmatmul.msk.f32.vlgmr.msra.gmra.mxu0 %vm1067_vm0, %v1292_v57 }
 0x170   :  { %v1064_v8 = vpop.permute.xlu0 %1063 }
 0x171   :  { %v1066_v62 = vperm.slane %v1064_v8, 0 }
 0x19d   :  { %v1088_v42 = vpop.f32.mrf.mxu0 }
 0x19e   :  { %v1089_v3 = vadd.f32 %v1088_v42, %v1066_v62 }
 0x1a0   :  { %1091 = vst [vmem:[#allocation3] sm:$0x1] %v1089_v3 }
 0x1a1   :  { %1102 = dma.vmem_to_hbm [thread:$0]  %s1098_s20, 16, %s1100_s22, [#allocation4]  }
 0x1a2   :  { %1281 = dma.done.wait [#allocation4], 16  }
 0x1a3   :  { %1282 = vsyncadd [#allocation4], 4294967280 }
 0x1a4   :  { %1107 = vsyncpa [#allocation4], 1 }

</bundles_post_ra>
